<compile_context>
chip_gen: v7x
topology: tpu7x:2x2x1
jax: 0.10.0
libtpu: 0.0.40
codegen_flags: <defaults>
</compile_context>

<pallas_src>
import functools
import math

import jax
import jax.numpy as jnp
from jax import lax
from jax.experimental import pallas as pl
from jax.experimental.pallas import tpu as pltpu

H = 32                 # LSTM hidden size (fixed by the module definition)
G = 8 * H              # fused fwd+rev gate width: [i_f,i_r,f_f,f_r,g_f,g_r,o_f,o_r]
BT_MIN = 8             # sublane granularity
BT_MAX_DEFAULT = 128   # batch-tile cap (128 aligns with one MXU pass on v5e;
                       # 256 is also a good choice on v6e/v7x)
UNROLL_T_MAX = 16      # fully unroll the recurrence only for short sequences


def _round_up(x, m):
    return (x + m - 1) // m * m


# ----------------------------------------------------------------------------
# Weight packing: scatter per-direction [i,f,g,o] gate columns into the
# interleaved 256-wide layout [i_f,i_r,f_f,f_r,g_f,g_r,o_f,o_r].
# ----------------------------------------------------------------------------
def _scatter_gate_cols(w, rev):
    """w: (rows, 4H) gate-ordered columns -> (rows, 8H) in its direction's slots."""
    rows = w.shape[0]
    z = jnp.zeros((rows, H), w.dtype)
    parts = []
    for k in range(4):
        blk = w[:, k * H:(k + 1) * H]
        parts.extend([z, blk] if rev else [blk, z])
    return jnp.concatenate(parts, axis=-1)


def _pack_params(params, compute_dtype):
    p0f, p0r = params['lstm0']['fwd'], params['lstm0']['rev']
    p1f, p1r = params['lstm1']['fwd'], params['lstm1']['rev']
    # Layer 1: input is x_comb[t] = [x[t] | x[T-1-t]]  (2E features).
    wi1 = jnp.concatenate([_scatter_gate_cols(p0f['w_i'], False),
                           _scatter_gate_cols(p0r['w_i'], True)], axis=0)
    wh1 = jnp.concatenate([_scatter_gate_cols(p0f['w_h'], False),
                           _scatter_gate_cols(p0r['w_h'], True)], axis=0)
    b1 = _scatter_gate_cols(p0f['b'], False) + _scatter_gate_cols(p0r['b'], True)
    # Layer 2 recurrent weights / bias, same block-diagonal packing.
    wh2 = jnp.concatenate([_scatter_gate_cols(p1f['w_h'], False),
                           _scatter_gate_cols(p1r['w_h'], True)], axis=0)
    b2 = _scatter_gate_cols(p1f['b'], False) + _scatter_gate_cols(p1r['b'], True)
    # Layer 2 input projection fused into ONE (4H, G) weight applied to the
    # combined layer-1 scratch row  ycc[t] = [yc[t] | ycr[t]]  where
    #   yc[t]  = [yf1[t]     | yr1[T-1-t]]   (what layer-1 kernel step t produces)
    #   ycr[t] = [yf1[T-1-t] | yr1[t]]       (the time-reversed copy)
    # gin2[t] = ycc[t] @ w2 + b2 reproduces x2[t] @ Wi2 on the fwd gate cols and
    # x2[T-1-t] @ Wi2 on the rev gate cols.
    a2 = jnp.concatenate([_scatter_gate_cols(p1f['w_i'][:H], False),
                          _scatter_gate_cols(p1r['w_i'][H:], True)], axis=0)
    c2 = jnp.concatenate([_scatter_gate_cols(p1r['w_i'][:H], True),
                          _scatter_gate_cols(p1f['w_i'][H:], False)], axis=0)
    w2 = jnp.concatenate([a2, c2], axis=0)                       # (4H, G), K=128
    cdt = compute_dtype
    return dict(wi1=wi1.astype(cdt), wh1=wh1.astype(cdt),
                w2=w2.astype(cdt), wh2=wh2.astype(cdt),
                b1=b1.astype(jnp.float32), b2=b2.astype(jnp.float32),
                fc_w=params['fc_w'].reshape(1, 2 * H).astype(jnp.float32),
                fc_b=params['fc_b'].reshape(1, 1).astype(jnp.float32))


# ----------------------------------------------------------------------------
# Fused Pallas kernel: 2 bi-LSTM layers + last-timestep FC head
# ----------------------------------------------------------------------------
def _disc_kernel(x_ref, wi1_ref, b1_ref, wh1_ref, w2_ref, b2_ref, wh2_ref,
                 fcw_ref, fcb_ref, out_ref, gin, ycc, last_scr,
                 *, seq_len, unroll):
    T = seq_len
    Bt = x_ref.shape[1]
    E2 = x_ref.shape[2]
    cdt = wi1_ref.dtype   # MXU operand dtype (bf16 by default, f32 accumulate)

    # ---- layer-1 input projection: ONE flattened (T*Bt, E2)@(E2, G) matmul,
    # hoisted completely off the serial recurrence (tile-aligned reshape: Bt%8==0).
    x_flat = x_ref[...].reshape(T * Bt, E2)
    gin[...] = (jnp.dot(x_flat, wi1_ref[...], preferred_element_type=jnp.float32)
                + b1_ref[...])

    def run_layer(wh_ref, store_fn):
        wh = wh_ref[...]

        def body(t, carry):
            h, c = carry
            row = pl.multiple_of(t * Bt, Bt)
            gates = gin[pl.ds(row, Bt), :] + jnp.dot(
                h.astype(cdt), wh, preferred_element_type=jnp.float32)
            # Gate layout [i_f,i_r,f_f,f_r | g_f,g_r,o_f,o_r]:
            # sigmoid on the full 256-lane tile (2 EUP pushes), tanh only on the
            # second 128-lane vreg holding the g gates (1 push) -> 3 pushes/step,
            # no select.  (64-lane slices below at lane offsets 0/64 cost at most
            # a couple of XLU rotates/step; the XLU slot has slack here.)
            sg = jax.nn.sigmoid(gates)
            th = jnp.tanh(gates[:, 4 * H:])
            i = sg[:, 0:2 * H]
            f = sg[:, 2 * H:4 * H]
            g = th[:, 0:2 * H]
            o = sg[:, 6 * H:8 * H]
            c = f * c + i * g
            h = o * jnp.tanh(c)          # h = [h_f | h_r]
            store_fn(t, h)
            return h, c

        init = (jnp.zeros((Bt, 2 * H), jnp.float32),
                jnp.zeros((Bt, 2 * H), jnp.float32))
        h, _ = lax.fori_loop(0, T, body, init, unroll=unroll)
        return h

    # ---- layer 1 recurrence -------------------------------------------------
    def store1(t, h):
        hb = h.astype(ycc.dtype)
        row_f = pl.multiple_of(t * Bt, Bt)
        row_r = pl.multiple_of((T - 1 - t) * Bt, Bt)
        ycc[pl.ds(row_f, Bt), 0:2 * H] = hb          # yc[t]
        ycc[pl.ds(row_r, Bt), 2 * H:4 * H] = hb      # ycr[T-1-t]

    run_layer(wh1_ref, store1)

    # ---- layer-2 input projection: one (T*Bt, 4H)@(4H, G) matmul ------------
    # (inter-layer dropout p=0.18: eval-mode identity)
    gin[...] = (jnp.dot(ycc[...], w2_ref[...], preferred_element_type=jnp.float32)
                + b2_ref[...])

    def store2(t, h):
        @pl.when(t == 0)
        def _():
            last_scr[...] = h   # lanes H:2H = reverse hidden at output pos T-1

    h_final = run_layer(wh2_ref, store2)

    # out[:, -1, :] == [fwd hidden at T-1 | rev hidden at T-1]
    fwd_mask = lax.broadcasted_iota(jnp.int32, (Bt, 2 * H), 1) < H
    last = jnp.where(fwd_mask, h_final, last_scr[...])
    # FC head (2H -> 1) on the VPU + one lane reduction (avoids an N=1 MXU pass).
    out_ref[...] = (jnp.sum(last * fcw_ref[...], axis=-1, keepdims=True)
                    + fcb_ref[...])


# ----------------------------------------------------------------------------
# Wrapper (glue): embedding gather, batch padding, time-reverse concat, call
# ----------------------------------------------------------------------------
def _pick_batch_tile(batch, bt_max):
    bp = _round_up(max(batch, 1), BT_MIN)
    bt = min(_round_up(bt_max, BT_MIN), bp)
    # v7x has two TensorCores: when one tile would cover the whole (padded)
    # batch, halve it so the ("parallel",) batch axis has >= 2 grid steps.
    if bt == bp and bp >= 2 * BT_MIN:
        bt = _round_up(bp // 2, BT_MIN)
    return bt


@functools.partial(jax.jit,
                   static_argnames=("compute_dtype", "bt_max", "time_unroll"))
def discriminator_forward(tokens, params, *, compute_dtype=jnp.bfloat16,
                          bt_max=BT_MAX_DEFAULT, time_unroll=None):
    """tokens: (B, T) int32 -> (B, 1) float32."""
    B, T = tokens.shape
    BT = _pick_batch_tile(B, bt_max)
    Bp = _round_up(B, BT)
    do_unroll = (T <= UNROLL_T_MAX) if time_unroll is None else bool(time_unroll)
    unroll = T if do_unroll else 1

    tok_p = jnp.pad(tokens.astype(jnp.int32), ((0, Bp - B), (0, 0)))
    emb = jnp.take(params['embedding'], tok_p, axis=0)            # (Bp, T, E)
    x_seq = jnp.transpose(emb, (1, 0, 2))                         # (T, Bp, E) time-major
    # x_comb[t] = [x[t] | x[T-1-t]]: one matmul feeds both directions' gates.
    x_comb = jnp.concatenate([x_seq, x_seq[::-1]], axis=-1).astype(compute_dtype)
    E2 = x_comb.shape[-1]

    pk = _pack_params(params, compute_dtype)

    def full(arr):
        return pl.BlockSpec(arr.shape, lambda b, _n=arr.ndim: (0,) * _n)

    # VMEM budget (v7x: 64 MiB physical, 32 MiB scoped default).
    isz = jnp.dtype(compute_dtype).itemsize
    pad128 = lambda n: _round_up(n, 128)
    est = (2 * T * BT * pad128(E2) * isz          # x block (double-buffered, lane-padded)
           + T * BT * G * 4                       # gate pre-activation scratch (f32)
           + T * BT * pad128(4 * H) * isz         # combined [yc|ycr] scratch
           + BT * pad128(2 * H) * 4               # last-step scratch
           + 2 * (pad128(E2) + 8 * H) * G * isz   # packed weights
           + 2 * BT * pad128(1) * 4)              # output block
    vmem_limit = int(min(64 << 20, max(32 << 20, int(est * 1.5))))

    out = pl.pallas_call(
        functools.partial(_disc_kernel, seq_len=T, unroll=unroll),
        out_shape=jax.ShapeDtypeStruct((Bp, 1), jnp.float32),
        grid=(Bp // BT,),
        in_specs=[
            pl.BlockSpec((T, BT, E2), lambda b: (0, b, 0)),
            full(pk['wi1']), full(pk['b1']), full(pk['wh1']),
            full(pk['w2']), full(pk['b2']), full(pk['wh2']),
            full(pk['fc_w']), full(pk['fc_b']),
        ],
        out_specs=pl.BlockSpec((BT, 1), lambda b: (b, 0)),
        scratch_shapes=[
            pltpu.VMEM((T * BT, G), jnp.float32),        # gate pre-activations
            pltpu.VMEM((T * BT, 4 * H), compute_dtype),  # [yc | ycr] layer-1 outputs
            pltpu.VMEM((BT, 2 * H), jnp.float32),        # layer-2 step-0 hidden
        ],
        compiler_params=pltpu.CompilerParams(
            dimension_semantics=("parallel",),           # batch tiles -> both TCs on v7x
            vmem_limit_bytes=vmem_limit),
    )(x_comb, pk['wi1'], pk['b1'], pk['wh1'], pk['w2'], pk['b2'], pk['wh2'],
      pk['fc_w'], pk['fc_b'])
    return out[:B]


# ----------------------------------------------------------------------------
# Deterministic parameter init (mirrors PyTorch init ranges)
# ----------------------------------------------------------------------------
def _lstm_dir_params(key, din):
    k1, k2, k3, k4 = jax.random.split(key, 4)
    bound = 1.0 / math.sqrt(H)
    w_ih = jax.random.uniform(k1, (4 * H, din), jnp.float32, -bound, bound)
    w_hh = jax.random.uniform(k2, (4 * H, H), jnp.float32, -bound, bound)
    b_ih = jax.random.uniform(k3, (4 * H,), jnp.float32, -bound, bound)
    b_hh = jax.random.uniform(k4, (4 * H,), jnp.float32, -bound, bound)
    return dict(w_i=w_ih.T, w_h=w_hh.T, b=(b_ih + b_hh).reshape(1, 4 * H))


def init_params(key, vocab_size, embedding_dim):
    ks = jax.random.split(key, 7)
    emb = jax.random.normal(ks[0], (vocab_size, embedding_dim), jnp.float32)
    emb = emb.at[0].set(0.0)  # padding_idx=0
    lstm0 = dict(fwd=_lstm_dir_params(ks[1], embedding_dim),
                 rev=_lstm_dir_params(ks[2], embedding_dim))
    lstm1 = dict(fwd=_lstm_dir_params(ks[3], 2 * H),
                 rev=_lstm_dir_params(ks[4], 2 * H))
    fb = 1.0 / math.sqrt(2 * H)
    fc_w = jax.random.uniform(ks[5], (1, 2 * H), jnp.float32, -fb, fb)
    fc_b = jax.random.uniform(ks[6], (1,), jnp.float32, -fb, fb)
    return dict(embedding=emb, lstm0=lstm0, lstm1=lstm1,
                fc_w=fc_w.T, fc_b=fc_b.reshape(1, 1))


# ----------------------------------------------------------------------------
# Pure-JAX reference (same math, lax.scan) for correctness checks
# ----------------------------------------------------------------------------
def _ref_lstm_dir(x_seq, p, reverse):
    B = x_seq.shape[1]

    def step(carry, x_t):
        h, c = carry
        gates = x_t @ p['w_i'] + h @ p['w_h'] + p['b']
        i = jax.nn.sigmoid(gates[:, :H])
        f = jax.nn.sigmoid(gates[:, H:2 * H])
        g = jnp.tanh(gates[:, 2 * H:3 * H])
        o = jax.nn.sigmoid(gates[:, 3 * H:])
        c = f * c + i * g
        h = o * jnp.tanh(c)
        return (h, c), h

    init = (jnp.zeros((B, H), jnp.float32), jnp.zeros((B, H), jnp.float32))
    xs = x_seq[::-1] if reverse else x_seq
    _, ys = lax.scan(step, init, xs)
    return ys[::-1] if reverse else ys


def reference_forward(tokens, params):
    emb = jnp.take(params['embedding'], tokens.astype(jnp.int32), axis=0)
    x = jnp.transpose(emb, (1, 0, 2)).astype(jnp.float32)
    yf1 = _ref_lstm_dir(x, params['lstm0']['fwd'], False)
    yr1 = _ref_lstm_dir(x, params['lstm0']['rev'], True)
    x2 = jnp.concatenate([yf1, yr1], axis=-1)
    yf2 = _ref_lstm_dir(x2, params['lstm1']['fwd'], False)
    yr2 = _ref_lstm_dir(x2, params['lstm1']['rev'], True)
    last = jnp.concatenate([yf2[-1], yr2[-1]], axis=-1)
    return last @ params['fc_w'] + params['fc_b']


# ----------------------------------------------------------------------------
if __name__ == "__main__":
    vocab_size, embedding_dim = 20, 16
    B, T = 2, 8

    key = jax.random.PRNGKey(0)
    k_params, k_tokens = jax.random.split(key)
    params = init_params(k_params, vocab_size, embedding_dim)
    tokens = jax.random.randint(k_tokens, (B, T), 0, vocab_size, dtype=jnp.int32)

    ref = jax.block_until_ready(reference_forward(tokens, params))

    # f32 compute path: tight check of the packing / recurrence / head.
    out_f32 = jax.block_until_ready(
        discriminator_forward(tokens, params, compute_dtype=jnp.float32))
    assert out_f32.shape == (B, 1), out_f32.shape
    assert jnp.allclose(out_f32, ref, rtol=1e-3, atol=1e-3), (out_f32, ref)

    # Default bf16-MXU path (unrolled recurrence): looser numerical tolerance.
    out = jax.block_until_ready(discriminator_forward(tokens, params))
    assert out.shape == (B, 1), out.shape
    assert jnp.allclose(out, ref, rtol=5e-2, atol=5e-2), (out, ref)

    # Rolled (fori_loop) recurrence path used for long sequences.
    out_rolled = jax.block_until_ready(
        discriminator_forward(tokens, params, time_unroll=False))
    assert jnp.allclose(out_rolled, ref, rtol=5e-2, atol=5e-2), (out_rolled, ref)

    print("KERNEL_OK")
</pallas_src>

<mosaic_0001>
module attributes {stable_mosaic.version = 11 : i64} {
  func.func @_disc_kernel(%arg0: i32, %arg1: memref<8x8x32xf32, #tpu.memory_space<vmem>>, %arg2: memref<32x256xf32, #tpu.memory_space<vmem>>, %arg3: memref<1x256xf32, #tpu.memory_space<vmem>>, %arg4: memref<64x256xf32, #tpu.memory_space<vmem>>, %arg5: memref<128x256xf32, #tpu.memory_space<vmem>>, %arg6: memref<1x256xf32, #tpu.memory_space<vmem>>, %arg7: memref<64x256xf32, #tpu.memory_space<vmem>>, %arg8: memref<1x64xf32, #tpu.memory_space<vmem>>, %arg9: memref<1x1xf32, #tpu.memory_space<vmem>>, %arg10: memref<8x1xf32, #tpu.memory_space<vmem>>, %arg11: memref<64x256xf32, #tpu.memory_space<vmem>>, %arg12: memref<64x128xf32, #tpu.memory_space<vmem>>, %arg13: memref<8x64xf32, #tpu.memory_space<vmem>>) attributes {dimension_semantics = [#tpu.dimension_semantics<parallel>], iteration_bounds = array<i64: 1>, scalar_prefetch = 0 : i64, scratch_operands = 3 : i64, tpu.core_type = #tpu.core_type<tc>, window_params = [{transform_indices = @transform_0, window_bounds = array<i64: 8, 8, 32>}, {pipeline_mode = #tpu.pipeline_mode<synchronous>, transform_indices = @transform_1, window_bounds = array<i64: 32, 256>}, {pipeline_mode = #tpu.pipeline_mode<synchronous>, transform_indices = @transform_2, window_bounds = array<i64: 1, 256>}, {pipeline_mode = #tpu.pipeline_mode<synchronous>, transform_indices = @transform_3, window_bounds = array<i64: 64, 256>}, {pipeline_mode = #tpu.pipeline_mode<synchronous>, transform_indices = @transform_4, window_bounds = array<i64: 128, 256>}, {pipeline_mode = #tpu.pipeline_mode<synchronous>, transform_indices = @transform_5, window_bounds = array<i64: 1, 256>}, {pipeline_mode = #tpu.pipeline_mode<synchronous>, transform_indices = @transform_6, window_bounds = array<i64: 64, 256>}, {pipeline_mode = #tpu.pipeline_mode<synchronous>, transform_indices = @transform_7, window_bounds = array<i64: 1, 64>}, {pipeline_mode = #tpu.pipeline_mode<synchronous>, transform_indices = @transform_8, window_bounds = array<i64: 1, 1>}, {transform_indices = @transform_9, window_bounds = array<i64: 8, 1>}]} {
    %c0 = arith.constant 0 : index
    %c0_0 = arith.constant 0 : index
    %c0_1 = arith.constant 0 : index
    %0 = vector.load %arg1[%c0, %c0_0, %c0_1] : memref<8x8x32xf32, #tpu.memory_space<vmem>>, vector<8x8x32xf32>
    %1 = vector.shape_cast %0 : vector<8x8x32xf32> to vector<64x32xf32>
    %c0_2 = arith.constant 0 : index
    %c0_3 = arith.constant 0 : index
    %2 = vector.load %arg2[%c0_2, %c0_3] : memref<32x256xf32, #tpu.memory_space<vmem>>, vector<32x256xf32>
    %cst = arith.constant dense<0.000000e+00> : vector<64x256xf32>
    %3 = tpu.matmul %1, %2, %cst {dimension_numbers = #tpu.dot_dimension_numbers<[1], [0], [0], [1], [0, 0, 1, 1], [], []>} : vector<64x32xf32>, vector<32x256xf32>, vector<64x256xf32> -> vector<64x256xf32>
    %c0_4 = arith.constant 0 : index
    %c0_5 = arith.constant 0 : index
    %4 = vector.load %arg3[%c0_4, %c0_5] : memref<1x256xf32, #tpu.memory_space<vmem>>, vector<1x256xf32>
    %5 = vector.broadcast %4 : vector<1x256xf32> to vector<64x256xf32>
    %6 = arith.addf %3, %5 : vector<64x256xf32>
    %c0_6 = arith.constant 0 : index
    %c0_7 = arith.constant 0 : index
    %7 = vector.load %arg11[%c0_6, %c0_7] : memref<64x256xf32, #tpu.memory_space<vmem>>, vector<64x256xf32>
    tpu.vector_store %arg11[%c0_6, %c0_7], %6 {strides = array<i32>} : memref<64x256xf32, #tpu.memory_space<vmem>>, vector<64x256xf32>,
    %c0_8 = arith.constant 0 : index
    %c0_9 = arith.constant 0 : index
    %8 = vector.load %arg4[%c0_8, %c0_9] : memref<64x256xf32, #tpu.memory_space<vmem>>, vector<64x256xf32>
    %cst_10 = arith.constant 0.000000e+00 : f32
    %9 = vector.broadcast %cst_10 : f32 to vector<8x64xf32>
    %cst_11 = arith.constant 0.000000e+00 : f32
    %10 = vector.broadcast %cst_11 : f32 to vector<8x64xf32>
    %c0_i32 = arith.constant 0 : i32
    %c8_i32 = arith.constant 8 : i32
    %11 = arith.muli %c0_i32, %c8_i32 : i32
    %12 = tpu.assume_multiple %11, 8 : i32
    %13 = arith.index_cast %12 : i32 to index
    %c0_12 = arith.constant 0 : index
    %14 = vector.load %arg11[%13, %c0_12] : memref<64x256xf32, #tpu.memory_space<vmem>>, vector<8x256xf32>
    %cst_13 = arith.constant dense<0.000000e+00> : vector<8x256xf32>
    %15 = tpu.matmul %9, %8, %cst_13 {dimension_numbers = #tpu.dot_dimension_numbers<[1], [0], [0], [1], [0, 0, 1, 1], [], []>} : vector<8x64xf32>, vector<64x256xf32>, vector<8x256xf32> -> vector<8x256xf32>
    %16 = arith.addf %14, %15 : vector<8x256xf32>
    %17 = arith.negf %16 : vector<8x256xf32>
    %18 = math.exp %17 : vector<8x256xf32>
    %cst_14 = arith.constant 1.000000e+00 : f32
    %19 = vector.broadcast %cst_14 : f32 to vector<8x256xf32>
    %20 = arith.addf %19, %18 : vector<8x256xf32>
    %21 = arith.divf %19, %20 : vector<8x256xf32>
    %22 = vector.extract_strided_slice %16 {offsets = [0, 128], sizes = [8, 128], strides = [1, 1]} : vector<8x256xf32> to vector<8x128xf32>
    %23 = math.tanh %22 : vector<8x128xf32>
    %24 = vector.extract_strided_slice %21 {offsets = [0, 0], sizes = [8, 64], strides = [1, 1]} : vector<8x256xf32> to vector<8x64xf32>
    %25 = vector.extract_strided_slice %21 {offsets = [0, 64], sizes = [8, 64], strides = [1, 1]} : vector<8x256xf32> to vector<8x64xf32>
    %26 = vector.extract_strided_slice %23 {offsets = [0, 0], sizes = [8, 64], strides = [1, 1]} : vector<8x128xf32> to vector<8x64xf32>
    %27 = vector.extract_strided_slice %21 {offsets = [0, 192], sizes = [8, 64], strides = [1, 1]} : vector<8x256xf32> to vector<8x64xf32>
    %28 = arith.mulf %25, %10 : vector<8x64xf32>
    %29 = arith.mulf %24, %26 : vector<8x64xf32>
    %30 = arith.addf %28, %29 : vector<8x64xf32>
    %31 = math.tanh %30 : vector<8x64xf32>
    %32 = arith.mulf %27, %31 : vector<8x64xf32>
    %c8_i32_15 = arith.constant 8 : i32
    %33 = arith.muli %c0_i32, %c8_i32_15 : i32
    %34 = tpu.assume_multiple %33, 8 : i32
    %c7_i32 = arith.constant 7 : i32
    %35 = arith.subi %c7_i32, %c0_i32 : i32
    %c8_i32_16 = arith.constant 8 : i32
    %36 = arith.muli %35, %c8_i32_16 : i32
    %37 = tpu.assume_multiple %36, 8 : i32
    %38 = arith.index_cast %34 : i32 to index
    %c0_17 = arith.constant 0 : index
    %39 = vector.load %arg12[%38, %c0_17] : memref<64x128xf32, #tpu.memory_space<vmem>>, vector<8x64xf32>
    tpu.vector_store %arg12[%38, %c0_17], %32 {strides = array<i32>} : memref<64x128xf32, #tpu.memory_space<vmem>>, vector<8x64xf32>,
    %40 = arith.index_cast %37 : i32 to index
    %c64 = arith.constant 64 : index
    %41 = vector.load %arg12[%40, %c64] : memref<64x128xf32, #tpu.memory_space<vmem>>, vector<8x64xf32>
    tpu.vector_store %arg12[%40, %c64], %32 {strides = array<i32>} : memref<64x128xf32, #tpu.memory_space<vmem>>, vector<8x64xf32>,
    %c1_i32 = arith.constant 1 : i32
    %c8_i32_18 = arith.constant 8 : i32
    %42 = arith.muli %c1_i32, %c8_i32_18 : i32
    %43 = tpu.assume_multiple %42, 8 : i32
    %44 = arith.index_cast %43 : i32 to index
    %c0_19 = arith.constant 0 : index
    %45 = vector.load %arg11[%44, %c0_19] : memref<64x256xf32, #tpu.memory_space<vmem>>, vector<8x256xf32>
    %cst_20 = arith.constant dense<0.000000e+00> : vector<8x256xf32>
    %46 = tpu.matmul %32, %8, %cst_20 {dimension_numbers = #tpu.dot_dimension_numbers<[1], [0], [0], [1], [0, 0, 1, 1], [], []>} : vector<8x64xf32>, vector<64x256xf32>, vector<8x256xf32> -> vector<8x256xf32>
    %47 = arith.addf %45, %46 : vector<8x256xf32>
    %48 = arith.negf %47 : vector<8x256xf32>
    %49 = math.exp %48 : vector<8x256xf32>
    %cst_21 = arith.constant 1.000000e+00 : f32
    %50 = vector.broadcast %cst_21 : f32 to vector<8x256xf32>
    %51 = arith.addf %50, %49 : vector<8x256xf32>
    %52 = arith.divf %50, %51 : vector<8x256xf32>
    %53 = vector.extract_strided_slice %47 {offsets = [0, 128], sizes = [8, 128], strides = [1, 1]} : vector<8x256xf32> to vector<8x128xf32>
    %54 = math.tanh %53 : vector<8x128xf32>
    %55 = vector.extract_strided_slice %52 {offsets = [0, 0], sizes = [8, 64], strides = [1, 1]} : vector<8x256xf32> to vector<8x64xf32>
    %56 = vector.extract_strided_slice %52 {offsets = [0, 64], sizes = [8, 64], strides = [1, 1]} : vector<8x256xf32> to vector<8x64xf32>
    %57 = vector.extract_strided_slice %54 {offsets = [0, 0], sizes = [8, 64], strides = [1, 1]} : vector<8x128xf32> to vector<8x64xf32>
    %58 = vector.extract_strided_slice %52 {offsets = [0, 192], sizes = [8, 64], strides = [1, 1]} : vector<8x256xf32> to vector<8x64xf32>
    %59 = arith.mulf %56, %30 : vector<8x64xf32>
    %60 = arith.mulf %55, %57 : vector<8x64xf32>
    %61 = arith.addf %59, %60 : vector<8x64xf32>
    %62 = math.tanh %61 : vector<8x64xf32>
    %63 = arith.mulf %58, %62 : vector<8x64xf32>
    %c8_i32_22 = arith.constant 8 : i32
    %64 = arith.muli %c1_i32, %c8_i32_22 : i32
    %65 = tpu.assume_multiple %64, 8 : i32
    %c7_i32_23 = arith.constant 7 : i32
    %66 = arith.subi %c7_i32_23, %c1_i32 : i32
    %c8_i32_24 = arith.constant 8 : i32
    %67 = arith.muli %66, %c8_i32_24 : i32
    %68 = tpu.assume_multiple %67, 8 : i32
    %69 = arith.index_cast %65 : i32 to index
    %c0_25 = arith.constant 0 : index
    %70 = vector.load %arg12[%69, %c0_25] : memref<64x128xf32, #tpu.memory_space<vmem>>, vector<8x64xf32>
    tpu.vector_store %arg12[%69, %c0_25], %63 {strides = array<i32>} : memref<64x128xf32, #tpu.memory_space<vmem>>, vector<8x64xf32>,
    %71 = arith.index_cast %68 : i32 to index
    %c64_26 = arith.constant 64 : index
    %72 = vector.load %arg12[%71, %c64_26] : memref<64x128xf32, #tpu.memory_space<vmem>>, vector<8x64xf32>
    tpu.vector_store %arg12[%71, %c64_26], %63 {strides = array<i32>} : memref<64x128xf32, #tpu.memory_space<vmem>>, vector<8x64xf32>,
    %c2_i32 = arith.constant 2 : i32
    %c8_i32_27 = arith.constant 8 : i32
    %73 = arith.muli %c2_i32, %c8_i32_27 : i32
    %74 = tpu.assume_multiple %73, 8 : i32
    %75 = arith.index_cast %74 : i32 to index
    %c0_28 = arith.constant 0 : index
    %76 = vector.load %arg11[%75, %c0_28] : memref<64x256xf32, #tpu.memory_space<vmem>>, vector<8x256xf32>
    %cst_29 = arith.constant dense<0.000000e+00> : vector<8x256xf32>
    %77 = tpu.matmul %63, %8, %cst_29 {dimension_numbers = #tpu.dot_dimension_numbers<[1], [0], [0], [1], [0, 0, 1, 1], [], []>} : vector<8x64xf32>, vector<64x256xf32>, vector<8x256xf32> -> vector<8x256xf32>
    %78 = arith.addf %76, %77 : vector<8x256xf32>
    %79 = arith.negf %78 : vector<8x256xf32>
    %80 = math.exp %79 : vector<8x256xf32>
    %cst_30 = arith.constant 1.000000e+00 : f32
    %81 = vector.broadcast %cst_30 : f32 to vector<8x256xf32>
    %82 = arith.addf %81, %80 : vector<8x256xf32>
    %83 = arith.divf %81, %82 : vector<8x256xf32>
    %84 = vector.extract_strided_slice %78 {offsets = [0, 128], sizes = [8, 128], strides = [1, 1]} : vector<8x256xf32> to vector<8x128xf32>
    %85 = math.tanh %84 : vector<8x128xf32>
    %86 = vector.extract_strided_slice %83 {offsets = [0, 0], sizes = [8, 64], strides = [1, 1]} : vector<8x256xf32> to vector<8x64xf32>
    %87 = vector.extract_strided_slice %83 {offsets = [0, 64], sizes = [8, 64], strides = [1, 1]} : vector<8x256xf32> to vector<8x64xf32>
    %88 = vector.extract_strided_slice %85 {offsets = [0, 0], sizes = [8, 64], strides = [1, 1]} : vector<8x128xf32> to vector<8x64xf32>
    %89 = vector.extract_strided_slice %83 {offsets = [0, 192], sizes = [8, 64], strides = [1, 1]} : vector<8x256xf32> to vector<8x64xf32>
    %90 = arith.mulf %87, %61 : vector<8x64xf32>
    %91 = arith.mulf %86, %88 : vector<8x64xf32>
    %92 = arith.addf %90, %91 : vector<8x64xf32>
    %93 = math.tanh %92 : vector<8x64xf32>
    %94 = arith.mulf %89, %93 : vector<8x64xf32>
    %c8_i32_31 = arith.constant 8 : i32
    %95 = arith.muli %c2_i32, %c8_i32_31 : i32
    %96 = tpu.assume_multiple %95, 8 : i32
    %c7_i32_32 = arith.constant 7 : i32
    %97 = arith.subi %c7_i32_32, %c2_i32 : i32
    %c8_i32_33 = arith.constant 8 : i32
    %98 = arith.muli %97, %c8_i32_33 : i32
    %99 = tpu.assume_multiple %98, 8 : i32
    %100 = arith.index_cast %96 : i32 to index
    %c0_34 = arith.constant 0 : index
    %101 = vector.load %arg12[%100, %c0_34] : memref<64x128xf32, #tpu.memory_space<vmem>>, vector<8x64xf32>
    tpu.vector_store %arg12[%100, %c0_34], %94 {strides = array<i32>} : memref<64x128xf32, #tpu.memory_space<vmem>>, vector<8x64xf32>,
    %102 = arith.index_cast %99 : i32 to index
    %c64_35 = arith.constant 64 : index
    %103 = vector.load %arg12[%102, %c64_35] : memref<64x128xf32, #tpu.memory_space<vmem>>, vector<8x64xf32>
    tpu.vector_store %arg12[%102, %c64_35], %94 {strides = array<i32>} : memref<64x128xf32, #tpu.memory_space<vmem>>, vector<8x64xf32>,
    %c3_i32 = arith.constant 3 : i32
    %c8_i32_36 = arith.constant 8 : i32
    %104 = arith.muli %c3_i32, %c8_i32_36 : i32
    %105 = tpu.assume_multiple %104, 8 : i32
    %106 = arith.index_cast %105 : i32 to index
    %c0_37 = arith.constant 0 : index
    %107 = vector.load %arg11[%106, %c0_37] : memref<64x256xf32, #tpu.memory_space<vmem>>, vector<8x256xf32>
    %cst_38 = arith.constant dense<0.000000e+00> : vector<8x256xf32>
    %108 = tpu.matmul %94, %8, %cst_38 {dimension_numbers = #tpu.dot_dimension_numbers<[1], [0], [0], [1], [0, 0, 1, 1], [], []>} : vector<8x64xf32>, vector<64x256xf32>, vector<8x256xf32> -> vector<8x256xf32>
    %109 = arith.addf %107, %108 : vector<8x256xf32>
    %110 = arith.negf %109 : vector<8x256xf32>
    %111 = math.exp %110 : vector<8x256xf32>
    %cst_39 = arith.constant 1.000000e+00 : f32
    %112 = vector.broadcast %cst_39 : f32 to vector<8x256xf32>
    %113 = arith.addf %112, %111 : vector<8x256xf32>
    %114 = arith.divf %112, %113 : vector<8x256xf32>
    %115 = vector.extract_strided_slice %109 {offsets = [0, 128], sizes = [8, 128], strides = [1, 1]} : vector<8x256xf32> to vector<8x128xf32>
    %116 = math.tanh %115 : vector<8x128xf32>
    %117 = vector.extract_strided_slice %114 {offsets = [0, 0], sizes = [8, 64], strides = [1, 1]} : vector<8x256xf32> to vector<8x64xf32>
    %118 = vector.extract_strided_slice %114 {offsets = [0, 64], sizes = [8, 64], strides = [1, 1]} : vector<8x256xf32> to vector<8x64xf32>
    %119 = vector.extract_strided_slice %116 {offsets = [0, 0], sizes = [8, 64], strides = [1, 1]} : vector<8x128xf32> to vector<8x64xf32>
    %120 = vector.extract_strided_slice %114 {offsets = [0, 192], sizes = [8, 64], strides = [1, 1]} : vector<8x256xf32> to vector<8x64xf32>
    %121 = arith.mulf %118, %92 : vector<8x64xf32>
    %122 = arith.mulf %117, %119 : vector<8x64xf32>
    %123 = arith.addf %121, %122 : vector<8x64xf32>
    %124 = math.tanh %123 : vector<8x64xf32>
    %125 = arith.mulf %120, %124 : vector<8x64xf32>
    %c8_i32_40 = arith.constant 8 : i32
    %126 = arith.muli %c3_i32, %c8_i32_40 : i32
    %127 = tpu.assume_multiple %126, 8 : i32
    %c7_i32_41 = arith.constant 7 : i32
    %128 = arith.subi %c7_i32_41, %c3_i32 : i32
    %c8_i32_42 = arith.constant 8 : i32
    %129 = arith.muli %128, %c8_i32_42 : i32
    %130 = tpu.assume_multiple %129, 8 : i32
    %131 = arith.index_cast %127 : i32 to index
    %c0_43 = arith.constant 0 : index
    %132 = vector.load %arg12[%131, %c0_43] : memref<64x128xf32, #tpu.memory_space<vmem>>, vector<8x64xf32>
    tpu.vector_store %arg12[%131, %c0_43], %125 {strides = array<i32>} : memref<64x128xf32, #tpu.memory_space<vmem>>, vector<8x64xf32>,
    %133 = arith.index_cast %130 : i32 to index
    %c64_44 = arith.constant 64 : index
    %134 = vector.load %arg12[%133, %c64_44] : memref<64x128xf32, #tpu.memory_space<vmem>>, vector<8x64xf32>
    tpu.vector_store %arg12[%133, %c64_44], %125 {strides = array<i32>} : memref<64x128xf32, #tpu.memory_space<vmem>>, vector<8x64xf32>,
    %c4_i32 = arith.constant 4 : i32
    %c8_i32_45 = arith.constant 8 : i32
    %135 = arith.muli %c4_i32, %c8_i32_45 : i32
    %136 = tpu.assume_multiple %135, 8 : i32
    %137 = arith.index_cast %136 : i32 to index
    %c0_46 = arith.constant 0 : index
    %138 = vector.load %arg11[%137, %c0_46] : memref<64x256xf32, #tpu.memory_space<vmem>>, vector<8x256xf32>
    %cst_47 = arith.constant dense<0.000000e+00> : vector<8x256xf32>
    %139 = tpu.matmul %125, %8, %cst_47 {dimension_numbers = #tpu.dot_dimension_numbers<[1], [0], [0], [1], [0, 0, 1, 1], [], []>} : vector<8x64xf32>, vector<64x256xf32>, vector<8x256xf32> -> vector<8x256xf32>
    %140 = arith.addf %138, %139 : vector<8x256xf32>
    %141 = arith.negf %140 : vector<8x256xf32>
    %142 = math.exp %141 : vector<8x256xf32>
    %cst_48 = arith.constant 1.000000e+00 : f32
    %143 = vector.broadcast %cst_48 : f32 to vector<8x256xf32>
    %144 = arith.addf %143, %142 : vector<8x256xf32>
    %145 = arith.divf %143, %144 : vector<8x256xf32>
    %146 = vector.extract_strided_slice %140 {offsets = [0, 128], sizes = [8, 128], strides = [1, 1]} : vector<8x256xf32> to vector<8x128xf32>
    %147 = math.tanh %146 : vector<8x128xf32>
    %148 = vector.extract_strided_slice %145 {offsets = [0, 0], sizes = [8, 64], strides = [1, 1]} : vector<8x256xf32> to vector<8x64xf32>
    %149 = vector.extract_strided_slice %145 {offsets = [0, 64], sizes = [8, 64], strides = [1, 1]} : vector<8x256xf32> to vector<8x64xf32>
    %150 = vector.extract_strided_slice %147 {offsets = [0, 0], sizes = [8, 64], strides = [1, 1]} : vector<8x128xf32> to vector<8x64xf32>
    %151 = vector.extract_strided_slice %145 {offsets = [0, 192], sizes = [8, 64], strides = [1, 1]} : vector<8x256xf32> to vector<8x64xf32>
    %152 = arith.mulf %149, %123 : vector<8x64xf32>
    %153 = arith.mulf %148, %150 : vector<8x64xf32>
    %154 = arith.addf %152, %153 : vector<8x64xf32>
    %155 = math.tanh %154 : vector<8x64xf32>
    %156 = arith.mulf %151, %155 : vector<8x64xf32>
    %c8_i32_49 = arith.constant 8 : i32
    %157 = arith.muli %c4_i32, %c8_i32_49 : i32
    %158 = tpu.assume_multiple %157, 8 : i32
    %c7_i32_50 = arith.constant 7 : i32
    %159 = arith.subi %c7_i32_50, %c4_i32 : i32
    %c8_i32_51 = arith.constant 8 : i32
    %160 = arith.muli %159, %c8_i32_51 : i32
    %161 = tpu.assume_multiple %160, 8 : i32
    %162 = arith.index_cast %158 : i32 to index
    %c0_52 = arith.constant 0 : index
    %163 = vector.load %arg12[%162, %c0_52] : memref<64x128xf32, #tpu.memory_space<vmem>>, vector<8x64xf32>
    tpu.vector_store %arg12[%162, %c0_52], %156 {strides = array<i32>} : memref<64x128xf32, #tpu.memory_space<vmem>>, vector<8x64xf32>,
    %164 = arith.index_cast %161 : i32 to index
    %c64_53 = arith.constant 64 : index
    %165 = vector.load %arg12[%164, %c64_53] : memref<64x128xf32, #tpu.memory_space<vmem>>, vector<8x64xf32>
    tpu.vector_store %arg12[%164, %c64_53], %156 {strides = array<i32>} : memref<64x128xf32, #tpu.memory_space<vmem>>, vector<8x64xf32>,
    %c5_i32 = arith.constant 5 : i32
    %c8_i32_54 = arith.constant 8 : i32
    %166 = arith.muli %c5_i32, %c8_i32_54 : i32
    %167 = tpu.assume_multiple %166, 8 : i32
    %168 = arith.index_cast %167 : i32 to index
    %c0_55 = arith.constant 0 : index
    %169 = vector.load %arg11[%168, %c0_55] : memref<64x256xf32, #tpu.memory_space<vmem>>, vector<8x256xf32>
    %cst_56 = arith.constant dense<0.000000e+00> : vector<8x256xf32>
    %170 = tpu.matmul %156, %8, %cst_56 {dimension_numbers = #tpu.dot_dimension_numbers<[1], [0], [0], [1], [0, 0, 1, 1], [], []>} : vector<8x64xf32>, vector<64x256xf32>, vector<8x256xf32> -> vector<8x256xf32>
    %171 = arith.addf %169, %170 : vector<8x256xf32>
    %172 = arith.negf %171 : vector<8x256xf32>
    %173 = math.exp %172 : vector<8x256xf32>
    %cst_57 = arith.constant 1.000000e+00 : f32
    %174 = vector.broadcast %cst_57 : f32 to vector<8x256xf32>
    %175 = arith.addf %174, %173 : vector<8x256xf32>
    %176 = arith.divf %174, %175 : vector<8x256xf32>
    %177 = vector.extract_strided_slice %171 {offsets = [0, 128], sizes = [8, 128], strides = [1, 1]} : vector<8x256xf32> to vector<8x128xf32>
    %178 = math.tanh %177 : vector<8x128xf32>
    %179 = vector.extract_strided_slice %176 {offsets = [0, 0], sizes = [8, 64], strides = [1, 1]} : vector<8x256xf32> to vector<8x64xf32>
    %180 = vector.extract_strided_slice %176 {offsets = [0, 64], sizes = [8, 64], strides = [1, 1]} : vector<8x256xf32> to vector<8x64xf32>
    %181 = vector.extract_strided_slice %178 {offsets = [0, 0], sizes = [8, 64], strides = [1, 1]} : vector<8x128xf32> to vector<8x64xf32>
    %182 = vector.extract_strided_slice %176 {offsets = [0, 192], sizes = [8, 64], strides = [1, 1]} : vector<8x256xf32> to vector<8x64xf32>
    %183 = arith.mulf %180, %154 : vector<8x64xf32>
    %184 = arith.mulf %179, %181 : vector<8x64xf32>
    %185 = arith.addf %183, %184 : vector<8x64xf32>
    %186 = math.tanh %185 : vector<8x64xf32>
    %187 = arith.mulf %182, %186 : vector<8x64xf32>
    %c8_i32_58 = arith.constant 8 : i32
    %188 = arith.muli %c5_i32, %c8_i32_58 : i32
    %189 = tpu.assume_multiple %188, 8 : i32
    %c7_i32_59 = arith.constant 7 : i32
    %190 = arith.subi %c7_i32_59, %c5_i32 : i32
    %c8_i32_60 = arith.constant 8 : i32
    %191 = arith.muli %190, %c8_i32_60 : i32
    %192 = tpu.assume_multiple %191, 8 : i32
    %193 = arith.index_cast %189 : i32 to index
    %c0_61 = arith.constant 0 : index
    %194 = vector.load %arg12[%193, %c0_61] : memref<64x128xf32, #tpu.memory_space<vmem>>, vector<8x64xf32>
    tpu.vector_store %arg12[%193, %c0_61], %187 {strides = array<i32>} : memref<64x128xf32, #tpu.memory_space<vmem>>, vector<8x64xf32>,
    %195 = arith.index_cast %192 : i32 to index
    %c64_62 = arith.constant 64 : index
    %196 = vector.load %arg12[%195, %c64_62] : memref<64x128xf32, #tpu.memory_space<vmem>>, vector<8x64xf32>
    tpu.vector_store %arg12[%195, %c64_62], %187 {strides = array<i32>} : memref<64x128xf32, #tpu.memory_space<vmem>>, vector<8x64xf32>,
    %c6_i32 = arith.constant 6 : i32
    %c8_i32_63 = arith.constant 8 : i32
    %197 = arith.muli %c6_i32, %c8_i32_63 : i32
    %198 = tpu.assume_multiple %197, 8 : i32
    %199 = arith.index_cast %198 : i32 to index
    %c0_64 = arith.constant 0 : index
    %200 = vector.load %arg11[%199, %c0_64] : memref<64x256xf32, #tpu.memory_space<vmem>>, vector<8x256xf32>
    %cst_65 = arith.constant dense<0.000000e+00> : vector<8x256xf32>
    %201 = tpu.matmul %187, %8, %cst_65 {dimension_numbers = #tpu.dot_dimension_numbers<[1], [0], [0], [1], [0, 0, 1, 1], [], []>} : vector<8x64xf32>, vector<64x256xf32>, vector<8x256xf32> -> vector<8x256xf32>
    %202 = arith.addf %200, %201 : vector<8x256xf32>
    %203 = arith.negf %202 : vector<8x256xf32>
    %204 = math.exp %203 : vector<8x256xf32>
    %cst_66 = arith.constant 1.000000e+00 : f32
    %205 = vector.broadcast %cst_66 : f32 to vector<8x256xf32>
    %206 = arith.addf %205, %204 : vector<8x256xf32>
    %207 = arith.divf %205, %206 : vector<8x256xf32>
    %208 = vector.extract_strided_slice %202 {offsets = [0, 128], sizes = [8, 128], strides = [1, 1]} : vector<8x256xf32> to vector<8x128xf32>
    %209 = math.tanh %208 : vector<8x128xf32>
    %210 = vector.extract_strided_slice %207 {offsets = [0, 0], sizes = [8, 64], strides = [1, 1]} : vector<8x256xf32> to vector<8x64xf32>
    %211 = vector.extract_strided_slice %207 {offsets = [0, 64], sizes = [8, 64], strides = [1, 1]} : vector<8x256xf32> to vector<8x64xf32>
    %212 = vector.extract_strided_slice %209 {offsets = [0, 0], sizes = [8, 64], strides = [1, 1]} : vector<8x128xf32> to vector<8x64xf32>
    %213 = vector.extract_strided_slice %207 {offsets = [0, 192], sizes = [8, 64], strides = [1, 1]} : vector<8x256xf32> to vector<8x64xf32>
    %214 = arith.mulf %211, %185 : vector<8x64xf32>
    %215 = arith.mulf %210, %212 : vector<8x64xf32>
    %216 = arith.addf %214, %215 : vector<8x64xf32>
    %217 = math.tanh %216 : vector<8x64xf32>
    %218 = arith.mulf %213, %217 : vector<8x64xf32>
    %c8_i32_67 = arith.constant 8 : i32
    %219 = arith.muli %c6_i32, %c8_i32_67 : i32
    %220 = tpu.assume_multiple %219, 8 : i32
    %c7_i32_68 = arith.constant 7 : i32
    %221 = arith.subi %c7_i32_68, %c6_i32 : i32
    %c8_i32_69 = arith.constant 8 : i32
    %222 = arith.muli %221, %c8_i32_69 : i32
    %223 = tpu.assume_multiple %222, 8 : i32
    %224 = arith.index_cast %220 : i32 to index
    %c0_70 = arith.constant 0 : index
    %225 = vector.load %arg12[%224, %c0_70] : memref<64x128xf32, #tpu.memory_space<vmem>>, vector<8x64xf32>
    tpu.vector_store %arg12[%224, %c0_70], %218 {strides = array<i32>} : memref<64x128xf32, #tpu.memory_space<vmem>>, vector<8x64xf32>,
    %226 = arith.index_cast %223 : i32 to index
    %c64_71 = arith.constant 64 : index
    %227 = vector.load %arg12[%226, %c64_71] : memref<64x128xf32, #tpu.memory_space<vmem>>, vector<8x64xf32>
    tpu.vector_store %arg12[%226, %c64_71], %218 {strides = array<i32>} : memref<64x128xf32, #tpu.memory_space<vmem>>, vector<8x64xf32>,
    %c7_i32_72 = arith.constant 7 : i32
    %c8_i32_73 = arith.constant 8 : i32
    %228 = arith.muli %c7_i32_72, %c8_i32_73 : i32
    %229 = tpu.assume_multiple %228, 8 : i32
    %230 = arith.index_cast %229 : i32 to index
    %c0_74 = arith.constant 0 : index
    %231 = vector.load %arg11[%230, %c0_74] : memref<64x256xf32, #tpu.memory_space<vmem>>, vector<8x256xf32>
    %cst_75 = arith.constant dense<0.000000e+00> : vector<8x256xf32>
    %232 = tpu.matmul %218, %8, %cst_75 {dimension_numbers = #tpu.dot_dimension_numbers<[1], [0], [0], [1], [0, 0, 1, 1], [], []>} : vector<8x64xf32>, vector<64x256xf32>, vector<8x256xf32> -> vector<8x256xf32>
    %233 = arith.addf %231, %232 : vector<8x256xf32>
    %234 = arith.negf %233 : vector<8x256xf32>
    %235 = math.exp %234 : vector<8x256xf32>
    %cst_76 = arith.constant 1.000000e+00 : f32
    %236 = vector.broadcast %cst_76 : f32 to vector<8x256xf32>
    %237 = arith.addf %236, %235 : vector<8x256xf32>
    %238 = arith.divf %236, %237 : vector<8x256xf32>
    %239 = vector.extract_strided_slice %233 {offsets = [0, 128], sizes = [8, 128], strides = [1, 1]} : vector<8x256xf32> to vector<8x128xf32>
    %240 = math.tanh %239 : vector<8x128xf32>
    %241 = vector.extract_strided_slice %238 {offsets = [0, 0], sizes = [8, 64], strides = [1, 1]} : vector<8x256xf32> to vector<8x64xf32>
    %242 = vector.extract_strided_slice %238 {offsets = [0, 64], sizes = [8, 64], strides = [1, 1]} : vector<8x256xf32> to vector<8x64xf32>
    %243 = vector.extract_strided_slice %240 {offsets = [0, 0], sizes = [8, 64], strides = [1, 1]} : vector<8x128xf32> to vector<8x64xf32>
    %244 = vector.extract_strided_slice %238 {offsets = [0, 192], sizes = [8, 64], strides = [1, 1]} : vector<8x256xf32> to vector<8x64xf32>
    %245 = arith.mulf %242, %216 : vector<8x64xf32>
    %246 = arith.mulf %241, %243 : vector<8x64xf32>
    %247 = arith.addf %245, %246 : vector<8x64xf32>
    %248 = math.tanh %247 : vector<8x64xf32>
    %249 = arith.mulf %244, %248 : vector<8x64xf32>
    %c8_i32_77 = arith.constant 8 : i32
    %250 = arith.muli %c7_i32_72, %c8_i32_77 : i32
    %251 = tpu.assume_multiple %250, 8 : i32
    %c7_i32_78 = arith.constant 7 : i32
    %252 = arith.subi %c7_i32_78, %c7_i32_72 : i32
    %c8_i32_79 = arith.constant 8 : i32
    %253 = arith.muli %252, %c8_i32_79 : i32
    %254 = tpu.assume_multiple %253, 8 : i32
    %255 = arith.index_cast %251 : i32 to index
    %c0_80 = arith.constant 0 : index
    %256 = vector.load %arg12[%255, %c0_80] : memref<64x128xf32, #tpu.memory_space<vmem>>, vector<8x64xf32>
    tpu.vector_store %arg12[%255, %c0_80], %249 {strides = array<i32>} : memref<64x128xf32, #tpu.memory_space<vmem>>, vector<8x64xf32>,
    %257 = arith.index_cast %254 : i32 to index
    %c64_81 = arith.constant 64 : index
    %258 = vector.load %arg12[%257, %c64_81] : memref<64x128xf32, #tpu.memory_space<vmem>>, vector<8x64xf32>
    tpu.vector_store %arg12[%257, %c64_81], %249 {strides = array<i32>} : memref<64x128xf32, #tpu.memory_space<vmem>>, vector<8x64xf32>,
    %c8_i32_82 = arith.constant 8 : i32
    %c0_83 = arith.constant 0 : index
    %c0_84 = arith.constant 0 : index
    %259 = vector.load %arg12[%c0_83, %c0_84] : memref<64x128xf32, #tpu.memory_space<vmem>>, vector<64x128xf32>
    %c0_85 = arith.constant 0 : index
    %c0_86 = arith.constant 0 : index
    %260 = vector.load %arg5[%c0_85, %c0_86] : memref<128x256xf32, #tpu.memory_space<vmem>>, vector<128x256xf32>
    %cst_87 = arith.constant dense<0.000000e+00> : vector<64x256xf32>
    %261 = tpu.matmul %259, %260, %cst_87 {dimension_numbers = #tpu.dot_dimension_numbers<[1], [0], [0], [1], [0, 0, 1, 1], [], []>} : vector<64x128xf32>, vector<128x256xf32>, vector<64x256xf32> -> vector<64x256xf32>
    %c0_88 = arith.constant 0 : index
    %c0_89 = arith.constant 0 : index
    %262 = vector.load %arg6[%c0_88, %c0_89] : memref<1x256xf32, #tpu.memory_space<vmem>>, vector<1x256xf32>
    %263 = vector.broadcast %262 : vector<1x256xf32> to vector<64x256xf32>
    %264 = arith.addf %261, %263 : vector<64x256xf32>
    %c0_90 = arith.constant 0 : index
    %c0_91 = arith.constant 0 : index
    %265 = vector.load %arg11[%c0_90, %c0_91] : memref<64x256xf32, #tpu.memory_space<vmem>>, vector<64x256xf32>
    tpu.vector_store %arg11[%c0_90, %c0_91], %264 {strides = array<i32>} : memref<64x256xf32, #tpu.memory_space<vmem>>, vector<64x256xf32>,
    %c0_92 = arith.constant 0 : index
    %c0_93 = arith.constant 0 : index
    %266 = vector.load %arg7[%c0_92, %c0_93] : memref<64x256xf32, #tpu.memory_space<vmem>>, vector<64x256xf32>
    %cst_94 = arith.constant 0.000000e+00 : f32
    %267 = vector.broadcast %cst_94 : f32 to vector<8x64xf32>
    %cst_95 = arith.constant 0.000000e+00 : f32
    %268 = vector.broadcast %cst_95 : f32 to vector<8x64xf32>
    %c0_i32_96 = arith.constant 0 : i32
    %c8_i32_97 = arith.constant 8 : i32
    %269 = arith.muli %c0_i32_96, %c8_i32_97 : i32
    %270 = tpu.assume_multiple %269, 8 : i32
    %271 = arith.index_cast %270 : i32 to index
    %c0_98 = arith.constant 0 : index
    %272 = vector.load %arg11[%271, %c0_98] : memref<64x256xf32, #tpu.memory_space<vmem>>, vector<8x256xf32>
    %cst_99 = arith.constant dense<0.000000e+00> : vector<8x256xf32>
    %273 = tpu.matmul %267, %266, %cst_99 {dimension_numbers = #tpu.dot_dimension_numbers<[1], [0], [0], [1], [0, 0, 1, 1], [], []>} : vector<8x64xf32>, vector<64x256xf32>, vector<8x256xf32> -> vector<8x256xf32>
    %274 = arith.addf %272, %273 : vector<8x256xf32>
    %275 = arith.negf %274 : vector<8x256xf32>
    %276 = math.exp %275 : vector<8x256xf32>
    %cst_100 = arith.constant 1.000000e+00 : f32
    %277 = vector.broadcast %cst_100 : f32 to vector<8x256xf32>
    %278 = arith.addf %277, %276 : vector<8x256xf32>
    %279 = arith.divf %277, %278 : vector<8x256xf32>
    %280 = vector.extract_strided_slice %274 {offsets = [0, 128], sizes = [8, 128], strides = [1, 1]} : vector<8x256xf32> to vector<8x128xf32>
    %281 = math.tanh %280 : vector<8x128xf32>
    %282 = vector.extract_strided_slice %279 {offsets = [0, 0], sizes = [8, 64], strides = [1, 1]} : vector<8x256xf32> to vector<8x64xf32>
    %283 = vector.extract_strided_slice %279 {offsets = [0, 64], sizes = [8, 64], strides = [1, 1]} : vector<8x256xf32> to vector<8x64xf32>
    %284 = vector.extract_strided_slice %281 {offsets = [0, 0], sizes = [8, 64], strides = [1, 1]} : vector<8x128xf32> to vector<8x64xf32>
    %285 = vector.extract_strided_slice %279 {offsets = [0, 192], sizes = [8, 64], strides = [1, 1]} : vector<8x256xf32> to vector<8x64xf32>
    %286 = arith.mulf %283, %268 : vector<8x64xf32>
    %287 = arith.mulf %282, %284 : vector<8x64xf32>
    %288 = arith.addf %286, %287 : vector<8x64xf32>
    %289 = math.tanh %288 : vector<8x64xf32>
    %290 = arith.mulf %285, %289 : vector<8x64xf32>
    %c0_i32_101 = arith.constant 0 : i32
    %291 = arith.cmpi eq, %c0_i32_96, %c0_i32_101 : i32
    %292 = arith.extui %291 : i1 to i32
    %c0_i32_102 = arith.constant 0 : i32
    %293 = arith.cmpi ne, %292, %c0_i32_102 : i32
    scf.if %293 {
      %c0_162 = arith.constant 0 : index
      %c0_163 = arith.constant 0 : index
      %483 = vector.load %arg13[%c0_162, %c0_163] : memref<8x64xf32, #tpu.memory_space<vmem>>, vector<8x64xf32>
      tpu.vector_store %arg13[%c0_162, %c0_163], %290 {strides = array<i32>} : memref<8x64xf32, #tpu.memory_space<vmem>>, vector<8x64xf32>,
    } else {
    }
    %c1_i32_103 = arith.constant 1 : i32
    %c8_i32_104 = arith.constant 8 : i32
    %294 = arith.muli %c1_i32_103, %c8_i32_104 : i32
    %295 = tpu.assume_multiple %294, 8 : i32
    %296 = arith.index_cast %295 : i32 to index
    %c0_105 = arith.constant 0 : index
    %297 = vector.load %arg11[%296, %c0_105] : memref<64x256xf32, #tpu.memory_space<vmem>>, vector<8x256xf32>
    %cst_106 = arith.constant dense<0.000000e+00> : vector<8x256xf32>
    %298 = tpu.matmul %290, %266, %cst_106 {dimension_numbers = #tpu.dot_dimension_numbers<[1], [0], [0], [1], [0, 0, 1, 1], [], []>} : vector<8x64xf32>, vector<64x256xf32>, vector<8x256xf32> -> vector<8x256xf32>
    %299 = arith.addf %297, %298 : vector<8x256xf32>
    %300 = arith.negf %299 : vector<8x256xf32>
    %301 = math.exp %300 : vector<8x256xf32>
    %cst_107 = arith.constant 1.000000e+00 : f32
    %302 = vector.broadcast %cst_107 : f32 to vector<8x256xf32>
    %303 = arith.addf %302, %301 : vector<8x256xf32>
    %304 = arith.divf %302, %303 : vector<8x256xf32>
    %305 = vector.extract_strided_slice %299 {offsets = [0, 128], sizes = [8, 128], strides = [1, 1]} : vector<8x256xf32> to vector<8x128xf32>
    %306 = math.tanh %305 : vector<8x128xf32>
    %307 = vector.extract_strided_slice %304 {offsets = [0, 0], sizes = [8, 64], strides = [1, 1]} : vector<8x256xf32> to vector<8x64xf32>
    %308 = vector.extract_strided_slice %304 {offsets = [0, 64], sizes = [8, 64], strides = [1, 1]} : vector<8x256xf32> to vector<8x64xf32>
    %309 = vector.extract_strided_slice %306 {offsets = [0, 0], sizes = [8, 64], strides = [1, 1]} : vector<8x128xf32> to vector<8x64xf32>
    %310 = vector.extract_strided_slice %304 {offsets = [0, 192], sizes = [8, 64], strides = [1, 1]} : vector<8x256xf32> to vector<8x64xf32>
    %311 = arith.mulf %308, %288 : vector<8x64xf32>
    %312 = arith.mulf %307, %309 : vector<8x64xf32>
    %313 = arith.addf %311, %312 : vector<8x64xf32>
    %314 = math.tanh %313 : vector<8x64xf32>
    %315 = arith.mulf %310, %314 : vector<8x64xf32>
    %c0_i32_108 = arith.constant 0 : i32
    %316 = arith.cmpi eq, %c1_i32_103, %c0_i32_108 : i32
    %317 = arith.extui %316 : i1 to i32
    %c0_i32_109 = arith.constant 0 : i32
    %318 = arith.cmpi ne, %317, %c0_i32_109 : i32
    scf.if %318 {
      %c0_162 = arith.constant 0 : index
      %c0_163 = arith.constant 0 : index
      %483 = vector.load %arg13[%c0_162, %c0_163] : memref<8x64xf32, #tpu.memory_space<vmem>>, vector<8x64xf32>
      tpu.vector_store %arg13[%c0_162, %c0_163], %315 {strides = array<i32>} : memref<8x64xf32, #tpu.memory_space<vmem>>, vector<8x64xf32>,
    } else {
    }
    %c2_i32_110 = arith.constant 2 : i32
    %c8_i32_111 = arith.constant 8 : i32
    %319 = arith.muli %c2_i32_110, %c8_i32_111 : i32
    %320 = tpu.assume_multiple %319, 8 : i32
    %321 = arith.index_cast %320 : i32 to index
    %c0_112 = arith.constant 0 : index
    %322 = vector.load %arg11[%321, %c0_112] : memref<64x256xf32, #tpu.memory_space<vmem>>, vector<8x256xf32>
    %cst_113 = arith.constant dense<0.000000e+00> : vector<8x256xf32>
    %323 = tpu.matmul %315, %266, %cst_113 {dimension_numbers = #tpu.dot_dimension_numbers<[1], [0], [0], [1], [0, 0, 1, 1], [], []>} : vector<8x64xf32>, vector<64x256xf32>, vector<8x256xf32> -> vector<8x256xf32>
    %324 = arith.addf %322, %323 : vector<8x256xf32>
    %325 = arith.negf %324 : vector<8x256xf32>
    %326 = math.exp %325 : vector<8x256xf32>
    %cst_114 = arith.constant 1.000000e+00 : f32
    %327 = vector.broadcast %cst_114 : f32 to vector<8x256xf32>
    %328 = arith.addf %327, %326 : vector<8x256xf32>
    %329 = arith.divf %327, %328 : vector<8x256xf32>
    %330 = vector.extract_strided_slice %324 {offsets = [0, 128], sizes = [8, 128], strides = [1, 1]} : vector<8x256xf32> to vector<8x128xf32>
    %331 = math.tanh %330 : vector<8x128xf32>
    %332 = vector.extract_strided_slice %329 {offsets = [0, 0], sizes = [8, 64], strides = [1, 1]} : vector<8x256xf32> to vector<8x64xf32>
    %333 = vector.extract_strided_slice %329 {offsets = [0, 64], sizes = [8, 64], strides = [1, 1]} : vector<8x256xf32> to vector<8x64xf32>
    %334 = vector.extract_strided_slice %331 {offsets = [0, 0], sizes = [8, 64], strides = [1, 1]} : vector<8x128xf32> to vector<8x64xf32>
    %335 = vector.extract_strided_slice %329 {offsets = [0, 192], sizes = [8, 64], strides = [1, 1]} : vector<8x256xf32> to vector<8x64xf32>
    %336 = arith.mulf %333, %313 : vector<8x64xf32>
    %337 = arith.mulf %332, %334 : vector<8x64xf32>
    %338 = arith.addf %336, %337 : vector<8x64xf32>
    %339 = math.tanh %338 : vector<8x64xf32>
    %340 = arith.mulf %335, %339 : vector<8x64xf32>
    %c0_i32_115 = arith.constant 0 : i32
    %341 = arith.cmpi eq, %c2_i32_110, %c0_i32_115 : i32
    %342 = arith.extui %341 : i1 to i32
    %c0_i32_116 = arith.constant 0 : i32
    %343 = arith.cmpi ne, %342, %c0_i32_116 : i32
    scf.if %343 {
      %c0_162 = arith.constant 0 : index
      %c0_163 = arith.constant 0 : index
      %483 = vector.load %arg13[%c0_162, %c0_163] : memref<8x64xf32, #tpu.memory_space<vmem>>, vector<8x64xf32>
      tpu.vector_store %arg13[%c0_162, %c0_163], %340 {strides = array<i32>} : memref<8x64xf32, #tpu.memory_space<vmem>>, vector<8x64xf32>,
    } else {
    }
    %c3_i32_117 = arith.constant 3 : i32
    %c8_i32_118 = arith.constant 8 : i32
    %344 = arith.muli %c3_i32_117, %c8_i32_118 : i32
    %345 = tpu.assume_multiple %344, 8 : i32
    %346 = arith.index_cast %345 : i32 to index
    %c0_119 = arith.constant 0 : index
    %347 = vector.load %arg11[%346, %c0_119] : memref<64x256xf32, #tpu.memory_space<vmem>>, vector<8x256xf32>
    %cst_120 = arith.constant dense<0.000000e+00> : vector<8x256xf32>
    %348 = tpu.matmul %340, %266, %cst_120 {dimension_numbers = #tpu.dot_dimension_numbers<[1], [0], [0], [1], [0, 0, 1, 1], [], []>} : vector<8x64xf32>, vector<64x256xf32>, vector<8x256xf32> -> vector<8x256xf32>
    %349 = arith.addf %347, %348 : vector<8x256xf32>
    %350 = arith.negf %349 : vector<8x256xf32>
    %351 = math.exp %350 : vector<8x256xf32>
    %cst_121 = arith.constant 1.000000e+00 : f32
    %352 = vector.broadcast %cst_121 : f32 to vector<8x256xf32>
    %353 = arith.addf %352, %351 : vector<8x256xf32>
    %354 = arith.divf %352, %353 : vector<8x256xf32>
    %355 = vector.extract_strided_slice %349 {offsets = [0, 128], sizes = [8, 128], strides = [1, 1]} : vector<8x256xf32> to vector<8x128xf32>
    %356 = math.tanh %355 : vector<8x128xf32>
    %357 = vector.extract_strided_slice %354 {offsets = [0, 0], sizes = [8, 64], strides = [1, 1]} : vector<8x256xf32> to vector<8x64xf32>
    %358 = vector.extract_strided_slice %354 {offsets = [0, 64], sizes = [8, 64], strides = [1, 1]} : vector<8x256xf32> to vector<8x64xf32>
    %359 = vector.extract_strided_slice %356 {offsets = [0, 0], sizes = [8, 64], strides = [1, 1]} : vector<8x128xf32> to vector<8x64xf32>
    %360 = vector.extract_strided_slice %354 {offsets = [0, 192], sizes = [8, 64], strides = [1, 1]} : vector<8x256xf32> to vector<8x64xf32>
    %361 = arith.mulf %358, %338 : vector<8x64xf32>
    %362 = arith.mulf %357, %359 : vector<8x64xf32>
    %363 = arith.addf %361, %362 : vector<8x64xf32>
    %364 = math.tanh %363 : vector<8x64xf32>
    %365 = arith.mulf %360, %364 : vector<8x64xf32>
    %c0_i32_122 = arith.constant 0 : i32
    %366 = arith.cmpi eq, %c3_i32_117, %c0_i32_122 : i32
    %367 = arith.extui %366 : i1 to i32
    %c0_i32_123 = arith.constant 0 : i32
    %368 = arith.cmpi ne, %367, %c0_i32_123 : i32
    scf.if %368 {
      %c0_162 = arith.constant 0 : index
      %c0_163 = arith.constant 0 : index
      %483 = vector.load %arg13[%c0_162, %c0_163] : memref<8x64xf32, #tpu.memory_space<vmem>>, vector<8x64xf32>
      tpu.vector_store %arg13[%c0_162, %c0_163], %365 {strides = array<i32>} : memref<8x64xf32, #tpu.memory_space<vmem>>, vector<8x64xf32>,
    } else {
    }
    %c4_i32_124 = arith.constant 4 : i32
    %c8_i32_125 = arith.constant 8 : i32
    %369 = arith.muli %c4_i32_124, %c8_i32_125 : i32
    %370 = tpu.assume_multiple %369, 8 : i32
    %371 = arith.index_cast %370 : i32 to index
    %c0_126 = arith.constant 0 : index
    %372 = vector.load %arg11[%371, %c0_126] : memref<64x256xf32, #tpu.memory_space<vmem>>, vector<8x256xf32>
    %cst_127 = arith.constant dense<0.000000e+00> : vector<8x256xf32>
    %373 = tpu.matmul %365, %266, %cst_127 {dimension_numbers = #tpu.dot_dimension_numbers<[1], [0], [0], [1], [0, 0, 1, 1], [], []>} : vector<8x64xf32>, vector<64x256xf32>, vector<8x256xf32> -> vector<8x256xf32>
    %374 = arith.addf %372, %373 : vector<8x256xf32>
    %375 = arith.negf %374 : vector<8x256xf32>
    %376 = math.exp %375 : vector<8x256xf32>
    %cst_128 = arith.constant 1.000000e+00 : f32
    %377 = vector.broadcast %cst_128 : f32 to vector<8x256xf32>
    %378 = arith.addf %377, %376 : vector<8x256xf32>
    %379 = arith.divf %377, %378 : vector<8x256xf32>
    %380 = vector.extract_strided_slice %374 {offsets = [0, 128], sizes = [8, 128], strides = [1, 1]} : vector<8x256xf32> to vector<8x128xf32>
    %381 = math.tanh %380 : vector<8x128xf32>
    %382 = vector.extract_strided_slice %379 {offsets = [0, 0], sizes = [8, 64], strides = [1, 1]} : vector<8x256xf32> to vector<8x64xf32>
    %383 = vector.extract_strided_slice %379 {offsets = [0, 64], sizes = [8, 64], strides = [1, 1]} : vector<8x256xf32> to vector<8x64xf32>
    %384 = vector.extract_strided_slice %381 {offsets = [0, 0], sizes = [8, 64], strides = [1, 1]} : vector<8x128xf32> to vector<8x64xf32>
    %385 = vector.extract_strided_slice %379 {offsets = [0, 192], sizes = [8, 64], strides = [1, 1]} : vector<8x256xf32> to vector<8x64xf32>
    %386 = arith.mulf %383, %363 : vector<8x64xf32>
    %387 = arith.mulf %382, %384 : vector<8x64xf32>
    %388 = arith.addf %386, %387 : vector<8x64xf32>
    %389 = math.tanh %388 : vector<8x64xf32>
    %390 = arith.mulf %385, %389 : vector<8x64xf32>
    %c0_i32_129 = arith.constant 0 : i32
    %391 = arith.cmpi eq, %c4_i32_124, %c0_i32_129 : i32
    %392 = arith.extui %391 : i1 to i32
    %c0_i32_130 = arith.constant 0 : i32
    %393 = arith.cmpi ne, %392, %c0_i32_130 : i32
    scf.if %393 {
      %c0_162 = arith.constant 0 : index
      %c0_163 = arith.constant 0 : index
      %483 = vector.load %arg13[%c0_162, %c0_163] : memref<8x64xf32, #tpu.memory_space<vmem>>, vector<8x64xf32>
      tpu.vector_store %arg13[%c0_162, %c0_163], %390 {strides = array<i32>} : memref<8x64xf32, #tpu.memory_space<vmem>>, vector<8x64xf32>,
    } else {
    }
    %c5_i32_131 = arith.constant 5 : i32
    %c8_i32_132 = arith.constant 8 : i32
    %394 = arith.muli %c5_i32_131, %c8_i32_132 : i32
    %395 = tpu.assume_multiple %394, 8 : i32
    %396 = arith.index_cast %395 : i32 to index
    %c0_133 = arith.constant 0 : index
    %397 = vector.load %arg11[%396, %c0_133] : memref<64x256xf32, #tpu.memory_space<vmem>>, vector<8x256xf32>
    %cst_134 = arith.constant dense<0.000000e+00> : vector<8x256xf32>
    %398 = tpu.matmul %390, %266, %cst_134 {dimension_numbers = #tpu.dot_dimension_numbers<[1], [0], [0], [1], [0, 0, 1, 1], [], []>} : vector<8x64xf32>, vector<64x256xf32>, vector<8x256xf32> -> vector<8x256xf32>
    %399 = arith.addf %397, %398 : vector<8x256xf32>
    %400 = arith.negf %399 : vector<8x256xf32>
    %401 = math.exp %400 : vector<8x256xf32>
    %cst_135 = arith.constant 1.000000e+00 : f32
    %402 = vector.broadcast %cst_135 : f32 to vector<8x256xf32>
    %403 = arith.addf %402, %401 : vector<8x256xf32>
    %404 = arith.divf %402, %403 : vector<8x256xf32>
    %405 = vector.extract_strided_slice %399 {offsets = [0, 128], sizes = [8, 128], strides = [1, 1]} : vector<8x256xf32> to vector<8x128xf32>
    %406 = math.tanh %405 : vector<8x128xf32>
    %407 = vector.extract_strided_slice %404 {offsets = [0, 0], sizes = [8, 64], strides = [1, 1]} : vector<8x256xf32> to vector<8x64xf32>
    %408 = vector.extract_strided_slice %404 {offsets = [0, 64], sizes = [8, 64], strides = [1, 1]} : vector<8x256xf32> to vector<8x64xf32>
    %409 = vector.extract_strided_slice %406 {offsets = [0, 0], sizes = [8, 64], strides = [1, 1]} : vector<8x128xf32> to vector<8x64xf32>
    %410 = vector.extract_strided_slice %404 {offsets = [0, 192], sizes = [8, 64], strides = [1, 1]} : vector<8x256xf32> to vector<8x64xf32>
    %411 = arith.mulf %408, %388 : vector<8x64xf32>
    %412 = arith.mulf %407, %409 : vector<8x64xf32>
    %413 = arith.addf %411, %412 : vector<8x64xf32>
    %414 = math.tanh %413 : vector<8x64xf32>
    %415 = arith.mulf %410, %414 : vector<8x64xf32>
    %c0_i32_136 = arith.constant 0 : i32
    %416 = arith.cmpi eq, %c5_i32_131, %c0_i32_136 : i32
    %417 = arith.extui %416 : i1 to i32
    %c0_i32_137 = arith.constant 0 : i32
    %418 = arith.cmpi ne, %417, %c0_i32_137 : i32
    scf.if %418 {
      %c0_162 = arith.constant 0 : index
      %c0_163 = arith.constant 0 : index
      %483 = vector.load %arg13[%c0_162, %c0_163] : memref<8x64xf32, #tpu.memory_space<vmem>>, vector<8x64xf32>
      tpu.vector_store %arg13[%c0_162, %c0_163], %415 {strides = array<i32>} : memref<8x64xf32, #tpu.memory_space<vmem>>, vector<8x64xf32>,
    } else {
    }
    %c6_i32_138 = arith.constant 6 : i32
    %c8_i32_139 = arith.constant 8 : i32
    %419 = arith.muli %c6_i32_138, %c8_i32_139 : i32
    %420 = tpu.assume_multiple %419, 8 : i32
    %421 = arith.index_cast %420 : i32 to index
    %c0_140 = arith.constant 0 : index
    %422 = vector.load %arg11[%421, %c0_140] : memref<64x256xf32, #tpu.memory_space<vmem>>, vector<8x256xf32>
    %cst_141 = arith.constant dense<0.000000e+00> : vector<8x256xf32>
    %423 = tpu.matmul %415, %266, %cst_141 {dimension_numbers = #tpu.dot_dimension_numbers<[1], [0], [0], [1], [0, 0, 1, 1], [], []>} : vector<8x64xf32>, vector<64x256xf32>, vector<8x256xf32> -> vector<8x256xf32>
    %424 = arith.addf %422, %423 : vector<8x256xf32>
    %425 = arith.negf %424 : vector<8x256xf32>
    %426 = math.exp %425 : vector<8x256xf32>
    %cst_142 = arith.constant 1.000000e+00 : f32
    %427 = vector.broadcast %cst_142 : f32 to vector<8x256xf32>
    %428 = arith.addf %427, %426 : vector<8x256xf32>
    %429 = arith.divf %427, %428 : vector<8x256xf32>
    %430 = vector.extract_strided_slice %424 {offsets = [0, 128], sizes = [8, 128], strides = [1, 1]} : vector<8x256xf32> to vector<8x128xf32>
    %431 = math.tanh %430 : vector<8x128xf32>
    %432 = vector.extract_strided_slice %429 {offsets = [0, 0], sizes = [8, 64], strides = [1, 1]} : vector<8x256xf32> to vector<8x64xf32>
    %433 = vector.extract_strided_slice %429 {offsets = [0, 64], sizes = [8, 64], strides = [1, 1]} : vector<8x256xf32> to vector<8x64xf32>
    %434 = vector.extract_strided_slice %431 {offsets = [0, 0], sizes = [8, 64], strides = [1, 1]} : vector<8x128xf32> to vector<8x64xf32>
    %435 = vector.extract_strided_slice %429 {offsets = [0, 192], sizes = [8, 64], strides = [1, 1]} : vector<8x256xf32> to vector<8x64xf32>
    %436 = arith.mulf %433, %413 : vector<8x64xf32>
    %437 = arith.mulf %432, %434 : vector<8x64xf32>
    %438 = arith.addf %436, %437 : vector<8x64xf32>
    %439 = math.tanh %438 : vector<8x64xf32>
    %440 = arith.mulf %435, %439 : vector<8x64xf32>
    %c0_i32_143 = arith.constant 0 : i32
    %441 = arith.cmpi eq, %c6_i32_138, %c0_i32_143 : i32
    %442 = arith.extui %441 : i1 to i32
    %c0_i32_144 = arith.constant 0 : i32
    %443 = arith.cmpi ne, %442, %c0_i32_144 : i32
    scf.if %443 {
      %c0_162 = arith.constant 0 : index
      %c0_163 = arith.constant 0 : index
      %483 = vector.load %arg13[%c0_162, %c0_163] : memref<8x64xf32, #tpu.memory_space<vmem>>, vector<8x64xf32>
      tpu.vector_store %arg13[%c0_162, %c0_163], %440 {strides = array<i32>} : memref<8x64xf32, #tpu.memory_space<vmem>>, vector<8x64xf32>,
    } else {
    }
    %c7_i32_145 = arith.constant 7 : i32
    %c8_i32_146 = arith.constant 8 : i32
    %444 = arith.muli %c7_i32_145, %c8_i32_146 : i32
    %445 = tpu.assume_multiple %444, 8 : i32
    %446 = arith.index_cast %445 : i32 to index
    %c0_147 = arith.constant 0 : index
    %447 = vector.load %arg11[%446, %c0_147] : memref<64x256xf32, #tpu.memory_space<vmem>>, vector<8x256xf32>
    %cst_148 = arith.constant dense<0.000000e+00> : vector<8x256xf32>
    %448 = tpu.matmul %440, %266, %cst_148 {dimension_numbers = #tpu.dot_dimension_numbers<[1], [0], [0], [1], [0, 0, 1, 1], [], []>} : vector<8x64xf32>, vector<64x256xf32>, vector<8x256xf32> -> vector<8x256xf32>
    %449 = arith.addf %447, %448 : vector<8x256xf32>
    %450 = arith.negf %449 : vector<8x256xf32>
    %451 = math.exp %450 : vector<8x256xf32>
    %cst_149 = arith.constant 1.000000e+00 : f32
    %452 = vector.broadcast %cst_149 : f32 to vector<8x256xf32>
    %453 = arith.addf %452, %451 : vector<8x256xf32>
    %454 = arith.divf %452, %453 : vector<8x256xf32>
    %455 = vector.extract_strided_slice %449 {offsets = [0, 128], sizes = [8, 128], strides = [1, 1]} : vector<8x256xf32> to vector<8x128xf32>
    %456 = math.tanh %455 : vector<8x128xf32>
    %457 = vector.extract_strided_slice %454 {offsets = [0, 0], sizes = [8, 64], strides = [1, 1]} : vector<8x256xf32> to vector<8x64xf32>
    %458 = vector.extract_strided_slice %454 {offsets = [0, 64], sizes = [8, 64], strides = [1, 1]} : vector<8x256xf32> to vector<8x64xf32>
    %459 = vector.extract_strided_slice %456 {offsets = [0, 0], sizes = [8, 64], strides = [1, 1]} : vector<8x128xf32> to vector<8x64xf32>
    %460 = vector.extract_strided_slice %454 {offsets = [0, 192], sizes = [8, 64], strides = [1, 1]} : vector<8x256xf32> to vector<8x64xf32>
    %461 = arith.mulf %458, %438 : vector<8x64xf32>
    %462 = arith.mulf %457, %459 : vector<8x64xf32>
    %463 = arith.addf %461, %462 : vector<8x64xf32>
    %464 = math.tanh %463 : vector<8x64xf32>
    %465 = arith.mulf %460, %464 : vector<8x64xf32>
    %c0_i32_150 = arith.constant 0 : i32
    %466 = arith.cmpi eq, %c7_i32_145, %c0_i32_150 : i32
    %467 = arith.extui %466 : i1 to i32
    %c0_i32_151 = arith.constant 0 : i32
    %468 = arith.cmpi ne, %467, %c0_i32_151 : i32
    scf.if %468 {
      %c0_162 = arith.constant 0 : index
      %c0_163 = arith.constant 0 : index
      %483 = vector.load %arg13[%c0_162, %c0_163] : memref<8x64xf32, #tpu.memory_space<vmem>>, vector<8x64xf32>
      tpu.vector_store %arg13[%c0_162, %c0_163], %465 {strides = array<i32>} : memref<8x64xf32, #tpu.memory_space<vmem>>, vector<8x64xf32>,
    } else {
    }
    %c8_i32_152 = arith.constant 8 : i32
    %469 = tpu.iota {dimensions = array<i32: 1>} : vector<8x64xi32>
    %c32_i32 = arith.constant 32 : i32
    %470 = vector.broadcast %c32_i32 : i32 to vector<8x64xi32>
    %471 = arith.cmpi slt, %469, %470 : vector<8x64xi32>
    %c0_153 = arith.constant 0 : index
    %c0_154 = arith.constant 0 : index
    %472 = vector.load %arg13[%c0_153, %c0_154] : memref<8x64xf32, #tpu.memory_space<vmem>>, vector<8x64xf32>
    %473 = arith.select %471, %465, %472 : vector<8x64xi1>, vector<8x64xf32>
    %c0_155 = arith.constant 0 : index
    %c0_156 = arith.constant 0 : index
    %474 = vector.load %arg8[%c0_155, %c0_156] : memref<1x64xf32, #tpu.memory_space<vmem>>, vector<1x64xf32>
    %475 = vector.broadcast %474 : vector<1x64xf32> to vector<8x64xf32>
    %476 = arith.mulf %473, %475 : vector<8x64xf32>
    %cst_157 = arith.constant dense<0.000000e+00> : vector<8xf32>
    %477 = vector.multi_reduction <add>, %476, %cst_157 [1] : vector<8x64xf32> to vector<8xf32>
    %478 = vector.shape_cast %477 : vector<8xf32> to vector<8x1xf32>
    %c0_158 = arith.constant 0 : index
    %c0_159 = arith.constant 0 : index
    %479 = vector.load %arg9[%c0_158, %c0_159] : memref<1x1xf32, #tpu.memory_space<vmem>>, vector<1x1xf32>
    %480 = vector.broadcast %479 : vector<1x1xf32> to vector<8x1xf32>
    %481 = arith.addf %478, %480 : vector<8x1xf32>
    %c0_160 = arith.constant 0 : index
    %c0_161 = arith.constant 0 : index
    %482 = vector.load %arg10[%c0_160, %c0_161] : memref<8x1xf32, #tpu.memory_space<vmem>>, vector<8x1xf32>
    tpu.vector_store %arg10[%c0_160, %c0_161], %481 {strides = array<i32>} : memref<8x1xf32, #tpu.memory_space<vmem>>, vector<8x1xf32>,
    return
  }
  func.func @transform_0(%arg0: i32) -> (i32, i32, i32) {
    %c0_i32 = arith.constant 0 : i32
    %c0_i32_0 = arith.constant 0 : i32
    %c0_i32_1 = arith.constant 0 : i32
    return %c0_i32, %arg0, %c0_i32_0 : i32, i32, i32
  }
  func.func @transform_1(%arg0: i32) -> (i32, i32) {
    %c0_i32 = arith.constant 0 : i32
    %c0_i32_0 = arith.constant 0 : i32
    %c0_i32_1 = arith.constant 0 : i32
    return %c0_i32, %c0_i32_0 : i32, i32
  }
  func.func @transform_2(%arg0: i32) -> (i32, i32) {
    %c0_i32 = arith.constant 0 : i32
    %c0_i32_0 = arith.constant 0 : i32
    %c0_i32_1 = arith.constant 0 : i32
    return %c0_i32, %c0_i32_0 : i32, i32
  }
  func.func @transform_3(%arg0: i32) -> (i32, i32) {
    %c0_i32 = arith.constant 0 : i32
    %c0_i32_0 = arith.constant 0 : i32
    %c0_i32_1 = arith.constant 0 : i32
    return %c0_i32, %c0_i32_0 : i32, i32
  }
  func.func @transform_4(%arg0: i32) -> (i32, i32) {
    %c0_i32 = arith.constant 0 : i32
    %c0_i32_0 = arith.constant 0 : i32
    %c0_i32_1 = arith.constant 0 : i32
    return %c0_i32, %c0_i32_0 : i32, i32
  }
  func.func @transform_5(%arg0: i32) -> (i32, i32) {
    %c0_i32 = arith.constant 0 : i32
    %c0_i32_0 = arith.constant 0 : i32
    %c0_i32_1 = arith.constant 0 : i32
    return %c0_i32, %c0_i32_0 : i32, i32
  }
  func.func @transform_6(%arg0: i32) -> (i32, i32) {
    %c0_i32 = arith.constant 0 : i32
    %c0_i32_0 = arith.constant 0 : i32
    %c0_i32_1 = arith.constant 0 : i32
    return %c0_i32, %c0_i32_0 : i32, i32
  }
  func.func @transform_7(%arg0: i32) -> (i32, i32) {
    %c0_i32 = arith.constant 0 : i32
    %c0_i32_0 = arith.constant 0 : i32
    %c0_i32_1 = arith.constant 0 : i32
    return %c0_i32, %c0_i32_0 : i32, i32
  }
  func.func @transform_8(%arg0: i32) -> (i32, i32) {
    %c0_i32 = arith.constant 0 : i32
    %c0_i32_0 = arith.constant 0 : i32
    %c0_i32_1 = arith.constant 0 : i32
    return %c0_i32, %c0_i32_0 : i32, i32
  }
  func.func @transform_9(%arg0: i32) -> (i32, i32) {
    %c0_i32 = arith.constant 0 : i32
    %c0_i32_0 = arith.constant 0 : i32
    return %arg0, %c0_i32 : i32, i32
  }
}

</mosaic_0001>

<bundles_post_ra>
// kernel: discriminator_forward.1
= control target key start
LH: loop header
LB: loop body
LE: loop exit
PB: predicated region body
PF: predicated region fallthrough
CT: control target
= control target key end

     0   :  { %v2767_v3 = vmov 0.0   ;;  %vm62_vm0 = vcmask 261120   ;;  %v52_v45 = vlaneseq  ;;  %vm342_vm1 = vcmask 1048064   ;;  %s3402_s1 = inlined_call_operand.vmem [shape: f32[32,256], index: 1, kind: input, shape index: {}]   ;;  %s3403_s3 = inlined_call_operand.vmem [shape: f32[64,256], index: 3, kind: input, shape index: {}]   ;;  %s3404_s0 = inlined_call_operand.vmem [shape: f32[8,8,32], index: 0, kind: input, shape index: {}]   ;;  %s3405_s2 = inlined_call_operand.vmem [shape: f32[1,256], index: 2, kind: input, shape index: {}]   ;;  %s3406_s4 = inlined_call_operand.vmem [shape: f32[128,256], index: 4, kind: input, shape index: {}]   ;;  %s3407_s6 = inlined_call_operand.vmem [shape: f32[64,256], index: 6, kind: input, shape index: {}]   ;;  %s3408_s5 = inlined_call_operand.vmem [shape: f32[1,256], index: 5, kind: input, shape index: {}]   ;;  %s3409_s8 = inlined_call_operand.<no memory space> [shape: f32[1,1], index: 8, kind: input, shape index: {}]   ;;  %s3410_s7 = inlined_call_operand.vmem [shape: f32[1,64], index: 7, kind: input, shape index: {}]   ;;  %s3411_s9 = inlined_call_operand.vmem [shape: f32[8,1], index: 9, kind: output, shape index: {}]  }
   0x1   :  { %v43_v0 = vld [vmem:[%s3402_s1 + $0x8] sm:$0xff]  ;;  %v45_v1 = vld [vmem:[%s3402_s1 + $0x18] sm:$0xff]  ;;  %v42_v2 = vld [vmem:[%s3402_s1] sm:$0xff]  ;;  %151 = vmatprep.mubr.f32.mxu0 %v2767_v3  ;;  %1222 = vmatprep.mubr.f32.mxu1 %v2767_v3  ;;  %vm237_vm2 = vcmask 523264   ;;  %vm2144_vm4 = vcmask 7168  }
   0x2   :  { %v2213_v4 = vpack.c.bf16 %v45_v1, %v43_v0  ;;  %v44_v5 = vld [vmem:[%s3402_s1 + $0x10] sm:$0xff]  ;;  %v47_v6 = vld [vmem:[%s3402_s1 + $0x28] sm:$0xff]  ;;  %v49_v7 = vld [vmem:[%s3402_s1 + $0x38] sm:$0xff]  ;;  %v2969_v46 = vshrl.u32 %v52_v45, 7 }
   0x3   :  { %v2215_v8 = vpack.c.bf16 %v44_v5, %v42_v2  ;;  %v2217_v9 = vpack.c.bf16 %v49_v7, %v47_v6  ;;  %v46_v10 = vld [vmem:[%s3402_s1 + $0x20] sm:$0xff]  ;;  %v48_v11 = vld [vmem:[%s3402_s1 + $0x30] sm:$0xff]  ;;  %v217_v12 = vld [vmem:[%s3403_s3 + $0x8] sm:$0xff] }
   0x4   :  { %2214 = vmatprep.subr.bf16.mxu0 %v2213_v4  ;;  %v219_v13 = vld [vmem:[%s3403_s3 + $0x18] sm:$0xff]  ;;  %v2219_v14 = vpack.c.bf16 %v48_v11, %v46_v10  ;;  %v216_v16 = vld [vmem:[%s3403_s3] sm:$0xff]  ;;  %v218_v17 = vld [vmem:[%s3403_s3 + $0x10] sm:$0xff]  ;;  %v54_v47 = vsub.s32 0, %v2969_v46  ;;  %v58_v54 = vsub.s32 1, %v2969_v46 }
   0x5   :  { %2216 = vmatpush1.bf16.msra.mxu0 %v2215_v8  ;;  %v2851_v15 = vpack.c.bf16 %v219_v13, %v217_v12  ;;  %v221_v18 = vld [vmem:[%s3403_s3 + $0x28] sm:$0xff]  ;;  %v223_v19 = vld [vmem:[%s3403_s3 + $0x38] sm:$0xff]  ;;  %v34_v20 = vld [vmem:[%s3404_s0] sm:$0xff]  ;;  %v2868_v21 = vpack.c.bf16 %v218_v17, %v216_v16 }
   0x6   :  { %2218 = vmatprep.subr.bf16.mxu0 %v2217_v9  ;;  %v2871_v22 = vpack.c.bf16 %v223_v19, %v221_v18  ;;  %v220_v23 = vld [vmem:[%s3403_s3 + $0x20] sm:$0xff]  ;;  %v222_v24 = vld [vmem:[%s3403_s3 + $0x30] sm:$0xff]  ;;  %v225_v25 = vld [vmem:[%s3403_s3 + $0x48] sm:$0xff] }
   0x7   :  { %v227_v26 = vld [vmem:[%s3403_s3 + $0x58] sm:$0xff]  ;;  %v35_v27 = vld [vmem:[%s3404_s0 + $0x8] sm:$0xff]  ;;  %v2891_v28 = vpack.c.bf16 %v222_v24, %v220_v23  ;;  %v224_v30 = vld [vmem:[%s3403_s3 + $0x40] sm:$0xff] }
   0x8   :  { %v2894_v29 = vpack.c.bf16 %v227_v26, %v225_v25  ;;  %v226_v31 = vld [vmem:[%s3403_s3 + $0x50] sm:$0xff]  ;;  %v229_v32 = vld [vmem:[%s3403_s3 + $0x68] sm:$0xff]  ;;  %v231_v33 = vld [vmem:[%s3403_s3 + $0x78] sm:$0xff] }
   0x9   :  { %2220 = vmatpush1.bf16.msra.mxu0 %v2219_v14  ;;  %v36_v34 = vld [vmem:[%s3404_s0 + $0x10] sm:$0xff]  ;;  %v2914_v35 = vpack.c.bf16 %v226_v31, %v224_v30  ;;  %v2917_v36 = vpack.c.bf16 %v231_v33, %v229_v32  ;;  %v228_v37 = vld [vmem:[%s3403_s3 + $0x60] sm:$0xff]  ;;  %v37_v39 = vld [vmem:[%s3404_s0 + $0x18] sm:$0xff] }
   0xa   :  { %2222 = vmatprep.subr.bf16.mxu0 %v2851_v15  ;;  %v230_v38 = vld [vmem:[%s3403_s3 + $0x70] sm:$0xff]  ;;  %v38_v41 = vld [vmem:[%s3404_s0 + $0x20] sm:$0xff]  ;;  %v39_v42 = vld [vmem:[%s3404_s0 + $0x28] sm:$0xff] }
   0xb   :  { %v2931_v40 = vpack.c.bf16 %v230_v38, %v228_v37  ;;  %v40_v43 = vld [vmem:[%s3404_s0 + $0x30] sm:$0xff]  ;;  %v41_v44 = vld [vmem:[%s3404_s0 + $0x38] sm:$0xff]  ;;  %v50_v48 = vld [vmem:[%s3405_s2] sm:$0x3]  ;;  %s2768_s2 = smov 64  }
   0xc   :  { %2157 = vmatmul.mubr.msk.f32.vlgmr.msra.gmra.mrb[0].mxu0 %vm62_vm0, %v34_v20  ;;  %v2977_v49 = vrot.slane %v50_v48, %v54_v47  ;;  %v2983_v55 = vrot.slane %v50_v48, %v58_v54 }
   0xd   :  { %2224 = vmatpush1.bf16.msra.mxu0 %v2868_v21  ;;  %157 = vmatprep.mubr.f32.mxu0 %v2767_v3 }
   0xe   :  { %2226 = vmatprep.subr.bf16.mxu0 %v2871_v22 }
  0x10   :  { %2158 = vmatmul.mubr.msk.f32.gmra.mrb[2].mxu0 %vm62_vm0, %v35_v27 }
  0x11   :  { %163 = vmatprep.mubr.f32.mxu0 %v2767_v3  ;;  %2228 = vmatpush1.bf16.msra.mxu0 %v2891_v28 }
  0x12   :  { %2230 = vmatprep.subr.bf16.mxu0 %v2894_v29 }
  0x14   :  { %2159 = vmatmul.mubr.msk.f32.gmra.mrb[4].mxu0 %vm62_vm0, %v36_v34 }
  0x15   :  { %169 = vmatprep.mubr.f32.mxu0 %v2767_v3  ;;  %2232 = vmatpush1.bf16.msra.mxu0 %v2914_v35 }
  0x16   :  { %2234 = vmatprep.subr.bf16.mxu0 %v2917_v36 }
  0x18   :  { %2160 = vmatmul.mubr.msk.f32.gmra.mrb[6].mxu0 %vm62_vm0, %v37_v39 }
  0x19   :  { %175 = vmatprep.mubr.f32.mxu0 %v2767_v3  ;;  %2236 = vmatpush1.bf16.msra.mxu0 %v2931_v40 }
  0x1a   :  { %2238 = vmatprep.subr.bf16.mxu0 %v2851_v15 }
  0x1c   :  { %2161 = vmatmul.mubr.msk.f32.gmra.mrb[8].mxu0 %vm62_vm0, %v38_v41 }
  0x1d   :  { %181 = vmatprep.mubr.f32.mxu0 %v2767_v3 }
  0x20   :  { %2162 = vmatmul.mubr.msk.f32.gmra.mrb[10].mxu0 %vm62_vm0, %v39_v42 }
  0x21   :  { %187 = vmatprep.mubr.f32.mxu0 %v2767_v3 }
  0x24   :  { %2163 = vmatmul.mubr.msk.f32.gmra.mrb[12].mxu0 %vm62_vm0, %v40_v43 }
  0x25   :  { %193 = vmatprep.mubr.f32.mxu0 %v2767_v3 }
  0x28   :  { %2164 = vmatmul.mubr.msk.f32.gmra.mrb[14].mxu0 %vm62_vm0, %v41_v44 }
  0x29   :  { %305 = vmatprep.mubr.f32.mxu0 %v2767_v3 }
  0x2c   :  { %306 = vmatmul.mubr.f32.vlgmr.msra.gmra.mrb[0].mxu0 %v2767_v3 }
  0x2d   :  { %2240 = vmatpush1.bf16.msra.mxu0 %v2868_v21  ;;  %415 = vmatprep.mubr.f32.mxu0 %v2767_v3 }
  0x2e   :  { %2242 = vmatprep.subr.bf16.mxu0 %v2871_v22 }
  0x31   :  { %2244 = vmatpush1.bf16.msra.mxu0 %v2891_v28 }
  0x32   :  { %2246 = vmatprep.subr.bf16.mxu0 %v2894_v29 }
  0x35   :  { %2248 = vmatpush1.bf16.msra.mxu0 %v2914_v35 }
  0x36   :  { %2250 = vmatprep.subr.bf16.mxu0 %v2917_v36 }
  0x39   :  { %2252 = vmatpush1.bf16.msra.mxu0 %v2931_v40 }
  0x3a   :  { %2254 = vmatprep.subr.bf16.mxu0 %v2851_v15 }
  0xff   :  { %v307_v50 = vpop.f32.mrb[0].mxu0 }
 0x100   :  { %v2509_v51 = vadd.f32 %v307_v50, %v2977_v49  ;;  %v309_v52 = vpop.f32.mrb[1].mxu0 }
 0x101   :  { %v2510_v56 = vadd.f32 %v309_v52, %v2983_v55 }
 0x102   :  { %v2165_v53 = vmul.f32 -1.442695, %v2509_v51 }
 0x103   :  { %v2166_v62 = vmul.f32 -1.442695, %v2510_v56 }
 0x104   :  { %2575 = vpow2.f32 %v2165_v53 }
 0x105   :  { %2577 = vtanh.f32 %v2510_v56 }
 0x10e   :  { %v2576_v57 = vpop.eup %2575 }
 0x10f   :  { %v320_v58 = vadd.f32 1.0, %v2576_v57  ;;  %v2578_v59 = vpop.eup %2577 }
 0x111   :  { %2579 = vrcp.f32 %v320_v58 }
 0x112   :  { %2581 = vpow2.f32 %v2166_v62 }
 0x11b   :  { %v2580_v60 = vpop.eup %2579 }
 0x11c   :  { %v328_v61 = vmul.f32 %v2580_v60, %v2578_v59  ;;  %v2582_v63 = vpop.eup %2581  ;;  %v327_v1 = vmul.f32 0.0, %v2580_v60 }
 0x11d   :  { %v321_v0 = vadd.f32 1.0, %v2582_v63 }
 0x11e   :  { %330 = vrot.lane.b32.xlu0 %v328_v61, %s2768_s2 }
 0x11f   :  { %2583 = vrcp.f32 %v321_v0 }
 0x129   :  { %v2584_v5 = vpop.eup %2583 }
 0x190   :  { %v331_v2 = vpop.permute.xlu0 %330 }
 0x191   :  { %v333_v4 = vadd.f32 %v331_v2, %v327_v1 }
 0x193   :  { %2585 = vtanh.f32 %v333_v4 }
 0x19d   :  { %v2586_v6 = vpop.eup %2585 }
 0x19e   :  { %v335_v7 = vmul.f32 %v2586_v6, %v2584_v5 }
 0x1a0   :  { %337 = vrot.lane.b32.xlu0 %v335_v7, %s2768_s2  ;;  %343 = vst.msk [vmem:[#allocation3 + $0x38] sm:$0xff] %vm342_vm1, %v335_v7 }
 0x212   :  { %v338_v8 = vpop.permute.xlu0 %337 }
 0x213   :  { %340 = vst.msk [vmem:[#allocation3] sm:$0xff] %vm237_vm2, %v338_v8  ;;  %2167 = vmatmul.mubr.msk.f32.vlgmr.msra.gmra.mrb[2].mxu0 %vm237_vm2, %v338_v8 }
 0x214   :  { %2256 = vmatpush1.bf16.msra.mxu0 %v2868_v21  ;;  %525 = vmatprep.mubr.f32.mxu0 %v2767_v3 }
 0x215   :  { %2258 = vmatprep.subr.bf16.mxu0 %v2871_v22 }
 0x218   :  { %2260 = vmatpush1.bf16.msra.mxu0 %v2891_v28 }
 0x219   :  { %2262 = vmatprep.subr.bf16.mxu0 %v2894_v29 }
 0x21c   :  { %2264 = vmatpush1.bf16.msra.mxu0 %v2914_v35 }
 0x21d   :  { %2266 = vmatprep.subr.bf16.mxu0 %v2917_v36 }
 0x220   :  { %2268 = vmatpush1.bf16.msra.mxu0 %v2931_v40 }
 0x221   :  { %2270 = vmatprep.subr.bf16.mxu0 %v2851_v15 }
 0x2e6   :  { %v417_v9 = vpop.f32.mrb[2].mxu0 }
 0x2e7   :  { %v2511_v10 = vadd.f32 %v417_v9, %v2977_v49  ;;  %v419_v11 = vpop.f32.mrb[3].mxu0 }
 0x2e8   :  { %v2512_v13 = vadd.f32 %v419_v11, %v2983_v55 }
 0x2e9   :  { %v2168_v12 = vmul.f32 -1.442695, %v2511_v10 }
 0x2ea   :  { %v2169_v20 = vmul.f32 -1.442695, %v2512_v13 }
 0x2eb   :  { %2587 = vpow2.f32 %v2168_v12 }
 0x2ec   :  { %2589 = vtanh.f32 %v2512_v13 }
 0x2f5   :  { %v2588_v14 = vpop.eup %2587 }
 0x2f6   :  { %v430_v16 = vadd.f32 1.0, %v2588_v14  ;;  %v2590_v17 = vpop.eup %2589 }
 0x2f8   :  { %2591 = vrcp.f32 %v430_v16 }
 0x2f9   :  { %2593 = vpow2.f32 %v2169_v20 }
 0x302   :  { %v2592_v18 = vpop.eup %2591 }
 0x303   :  { %v438_v19 = vmul.f32 %v2592_v18, %v2590_v17  ;;  %v2594_v23 = vpop.eup %2593  ;;  %v437_v25 = vmul.f32 %v2592_v18, %v333_v4 }
 0x304   :  { %v431_v24 = vadd.f32 1.0, %v2594_v23 }
 0x305   :  { %440 = vrot.lane.b32.xlu1 %v438_v19, %s2768_s2 }
 0x306   :  { %2595 = vrcp.f32 %v431_v24 }
 0x310   :  { %v2596_v30 = vpop.eup %2595 }
 0x377   :  { %v441_v26 = vpop.permute.xlu1 %440 }
 0x378   :  { %v443_v27 = vadd.f32 %v441_v26, %v437_v25 }
 0x37a   :  { %2597 = vtanh.f32 %v443_v27 }
 0x384   :  { %v2598_v31 = vpop.eup %2597 }
 0x385   :  { %v445_v32 = vmul.f32 %v2598_v31, %v2596_v30 }
 0x387   :  { %447 = vrot.lane.b32.xlu1 %v445_v32, %s2768_s2  ;;  %453 = vst.msk [vmem:[#allocation3 + $0x30] sm:$0xff] %vm342_vm1, %v445_v32 }
 0x3f9   :  { %v448_v33 = vpop.permute.xlu1 %447 }
 0x3fa   :  { %451 = vst.msk [vmem:[#allocation3 + $0x8] sm:$0xff] %vm237_vm2, %v448_v33  ;;  %2170 = vmatmul.mubr.msk.f32.vlgmr.msra.gmra.mrb[4].mxu0 %vm237_vm2, %v448_v33 }
 0x3fb   :  { %2272 = vmatpush1.bf16.msra.mxu0 %v2868_v21  ;;  %635 = vmatprep.mubr.f32.mxu0 %v2767_v3 }
 0x3fc   :  { %2274 = vmatprep.subr.bf16.mxu0 %v2871_v22 }
 0x3ff   :  { %2276 = vmatpush1.bf16.msra.mxu0 %v2891_v28 }
 0x400   :  { %2278 = vmatprep.subr.bf16.mxu0 %v2894_v29 }
 0x403   :  { %2280 = vmatpush1.bf16.msra.mxu0 %v2914_v35 }
 0x404   :  { %2282 = vmatprep.subr.bf16.mxu0 %v2917_v36 }
 0x407   :  { %2284 = vmatpush1.bf16.msra.mxu0 %v2931_v40 }
 0x408   :  { %2286 = vmatprep.subr.bf16.mxu0 %v2851_v15 }
 0x4cd   :  { %v527_v34 = vpop.f32.mrb[4].mxu0 }
 0x4ce   :  { %v2513_v37 = vadd.f32 %v527_v34, %v2977_v49  ;;  %v529_v38 = vpop.f32.mrb[5].mxu0 }
 0x4cf   :  { %v2514_v41 = vadd.f32 %v529_v38, %v2983_v55 }
 0x4d0   :  { %v2171_v39 = vmul.f32 -1.442695, %v2513_v37 }
 0x4d1   :  { %v2172_v51 = vmul.f32 -1.442695, %v2514_v41 }
 0x4d2   :  { %2599 = vpow2.f32 %v2171_v39 }
 0x4d3   :  { %2601 = vtanh.f32 %v2514_v41 }
 0x4dc   :  { %v2600_v42 = vpop.eup %2599 }
 0x4dd   :  { %v540_v43 = vadd.f32 1.0, %v2600_v42  ;;  %v2602_v44 = vpop.eup %2601 }
 0x4df   :  { %2603 = vrcp.f32 %v540_v43 }
 0x4e0   :  { %2605 = vpow2.f32 %v2172_v51 }
 0x4e9   :  { %v2604_v48 = vpop.eup %2603 }
 0x4ea   :  { %v548_v50 = vmul.f32 %v2604_v48, %v2602_v44  ;;  %v2606_v52 = vpop.eup %2605  ;;  %v547_v56 = vmul.f32 %v2604_v48, %v443_v27 }
 0x4eb   :  { %v541_v53 = vadd.f32 1.0, %v2606_v52 }
 0x4ec   :  { %550 = vrot.lane.b32.xlu0 %v548_v50, %s2768_s2 }
 0x4ed   :  { %2607 = vrcp.f32 %v541_v53 }
 0x4f7   :  { %v2608_v59 = vpop.eup %2607 }
 0x55e   :  { %v551_v57 = vpop.permute.xlu0 %550 }
 0x55f   :  { %v553_v58 = vadd.f32 %v551_v57, %v547_v56 }
 0x561   :  { %2609 = vtanh.f32 %v553_v58 }
 0x56b   :  { %v2610_v60 = vpop.eup %2609 }
 0x56c   :  { %v555_v61 = vmul.f32 %v2610_v60, %v2608_v59 }
 0x56e   :  { %557 = vrot.lane.b32.xlu1 %v555_v61, %s2768_s2  ;;  %563 = vst.msk [vmem:[#allocation3 + $0x28] sm:$0xff] %vm342_vm1, %v555_v61 }
 0x5e0   :  { %v558_v62 = vpop.permute.xlu1 %557 }
 0x5e1   :  { %561 = vst.msk [vmem:[#allocation3 + $0x10] sm:$0xff] %vm237_vm2, %v558_v62  ;;  %2173 = vmatmul.mubr.msk.f32.vlgmr.msra.gmra.mrb[6].mxu0 %vm237_vm2, %v558_v62 }
 0x5e2   :  { %2288 = vmatpush1.bf16.msra.mxu0 %v2868_v21  ;;  %745 = vmatprep.mubr.f32.mxu0 %v2767_v3 }
 0x5e3   :  { %2290 = vmatprep.subr.bf16.mxu0 %v2871_v22 }
 0x5e6   :  { %2292 = vmatpush1.bf16.msra.mxu0 %v2891_v28 }
 0x5e7   :  { %2294 = vmatprep.subr.bf16.mxu0 %v2894_v29 }
 0x5ea   :  { %2296 = vmatpush1.bf16.msra.mxu0 %v2914_v35 }
 0x5eb   :  { %2298 = vmatprep.subr.bf16.mxu0 %v2917_v36 }
 0x5ee   :  { %2300 = vmatpush1.bf16.msra.mxu0 %v2931_v40 }
 0x5ef   :  { %2302 = vmatprep.subr.bf16.mxu0 %v2851_v15 }
 0x6b4   :  { %v637_v63 = vpop.f32.mrb[6].mxu0 }
 0x6b5   :  { %v2515_v0 = vadd.f32 %v637_v63, %v2977_v49  ;;  %v639_v1 = vpop.f32.mrb[7].mxu0 }
 0x6b6   :  { %v2516_v4 = vadd.f32 %v639_v1, %v2983_v55 }
 0x6b7   :  { %v2174_v2 = vmul.f32 -1.442695, %v2515_v0 }
 0x6b8   :  { %v2175_v10 = vmul.f32 -1.442695, %v2516_v4 }
 0x6b9   :  { %2611 = vpow2.f32 %v2174_v2 }
 0x6ba   :  { %2613 = vtanh.f32 %v2516_v4 }
 0x6c3   :  { %v2612_v5 = vpop.eup %2611 }
 0x6c4   :  { %v650_v6 = vadd.f32 1.0, %v2612_v5  ;;  %v2614_v7 = vpop.eup %2613 }
 0x6c6   :  { %2615 = vrcp.f32 %v650_v6 }
 0x6c7   :  { %2617 = vpow2.f32 %v2175_v10 }
 0x6d0   :  { %v2616_v8 = vpop.eup %2615 }
 0x6d1   :  { %v658_v9 = vmul.f32 %v2616_v8, %v2614_v7  ;;  %v2618_v11 = vpop.eup %2617  ;;  %v657_v13 = vmul.f32 %v2616_v8, %v553_v58 }
 0x6d2   :  { %v651_v12 = vadd.f32 1.0, %v2618_v11 }
 0x6d3   :  { %660 = vrot.lane.b32.xlu0 %v658_v9, %s2768_s2 }
 0x6d4   :  { %2619 = vrcp.f32 %v651_v12 }
 0x6de   :  { %v2620_v17 = vpop.eup %2619 }
 0x745   :  { %v661_v14 = vpop.permute.xlu0 %660 }
 0x746   :  { %v663_v16 = vadd.f32 %v661_v14, %v657_v13 }
 0x748   :  { %2621 = vtanh.f32 %v663_v16 }
 0x752   :  { %v2622_v18 = vpop.eup %2621 }
 0x753   :  { %v665_v19 = vmul.f32 %v2622_v18, %v2620_v17 }
 0x755   :  { %667 = vrot.lane.b32.xlu1 %v665_v19, %s2768_s2  ;;  %673 = vst.msk [vmem:[#allocation3 + $0x20] sm:$0xff] %vm342_vm1, %v665_v19 }
 0x7c7   :  { %v668_v20 = vpop.permute.xlu1 %667 }
 0x7c8   :  { %671 = vst.msk [vmem:[#allocation3 + $0x18] sm:$0xff] %vm237_vm2, %v668_v20  ;;  %2176 = vmatmul.mubr.msk.f32.vlgmr.msra.gmra.mrb[8].mxu0 %vm237_vm2, %v668_v20 }
 0x7c9   :  { %2304 = vmatpush1.bf16.msra.mxu0 %v2868_v21  ;;  %853 = vmatprep.mubr.f32.mxu0 %v2767_v3 }
 0x7ca   :  { %2306 = vmatprep.subr.bf16.mxu0 %v2871_v22 }
 0x7cd   :  { %2308 = vmatpush1.bf16.msra.mxu0 %v2891_v28 }
 0x7ce   :  { %2310 = vmatprep.subr.bf16.mxu0 %v2894_v29 }
 0x7d1   :  { %2312 = vmatpush1.bf16.msra.mxu0 %v2914_v35 }
 0x7d2   :  { %2314 = vmatprep.subr.bf16.mxu0 %v2917_v36 }
 0x7d5   :  { %2316 = vmatpush1.bf16.msra.mxu0 %v2931_v40 }
 0x7d6   :  { %2318 = vmatprep.subr.bf16.mxu0 %v2851_v15 }
 0x89b   :  { %v747_v23 = vpop.f32.mrb[8].mxu0 }
 0x89c   :  { %v2517_v24 = vadd.f32 %v747_v23, %v2977_v49  ;;  %v749_v25 = vpop.f32.mrb[9].mxu0 }
 0x89d   :  { %v2518_v27 = vadd.f32 %v749_v25, %v2983_v55 }
 0x89e   :  { %v2177_v26 = vmul.f32 -1.442695, %v2517_v24 }
 0x89f   :  { %v2178_v37 = vmul.f32 -1.442695, %v2518_v27 }
 0x8a0   :  { %2623 = vpow2.f32 %v2177_v26  ;;  %v1115_v26 = vld [vmem:[%s3406_s4 + $0x8] sm:$0xff] }
 0x8a1   :  { %2625 = vtanh.f32 %v2518_v27  ;;  %v1117_v27 = vld [vmem:[%s3406_s4 + $0x18] sm:$0xff] }
 0x8aa   :  { %v2624_v30 = vpop.eup %2623 }
 0x8ab   :  { %v760_v31 = vadd.f32 1.0, %v2624_v30  ;;  %v2626_v32 = vpop.eup %2625  ;;  %v1114_v30 = vld [vmem:[%s3406_s4] sm:$0xff] }
 0x8ad   :  { %2627 = vrcp.f32 %v760_v31  ;;  %v2349_v31 = vpack.c.bf16 %v1117_v27, %v1115_v26 }
 0x8ae   :  { %2629 = vpow2.f32 %v2178_v37 }
 0x8af   :  { %2350 = vmatprep.subr.bf16.mxu1 %v2349_v31  ;;  %v1138_v31 = vld [vmem:[%s3406_s4 + $0xc0] sm:$0xff] }
 0x8b7   :  { %v2628_v33 = vpop.eup %2627 }
 0x8b8   :  { %v768_v34 = vmul.f32 %v2628_v33, %v2626_v32  ;;  %v2630_v38 = vpop.eup %2629  ;;  %v767_v41 = vmul.f32 %v2628_v33, %v663_v16  ;;  %v1116_v32 = vld [vmem:[%s3406_s4 + $0x10] sm:$0xff]  ;;  %v1119_v33 = vld [vmem:[%s3406_s4 + $0x28] sm:$0xff] }
 0x8b9   :  { %v761_v39 = vadd.f32 1.0, %v2630_v38  ;;  %v2351_v37 = vpack.c.bf16 %v1116_v32, %v1114_v30  ;;  %v1140_v32 = vld [vmem:[%s3406_s4 + $0xd0] sm:$0xff] }
 0x8ba   :  { %770 = vrot.lane.b32.xlu0 %v768_v34, %s2768_s2  ;;  %v1121_v34 = vld [vmem:[%s3406_s4 + $0x38] sm:$0xff] }
 0x8bb   :  { %2631 = vrcp.f32 %v761_v39  ;;  %v2353_v38 = vpack.c.bf16 %v1121_v34, %v1119_v33  ;;  %v1118_v39 = vld [vmem:[%s3406_s4 + $0x20] sm:$0xff]  ;;  %2352 = vmatpush1.bf16.msra.mxu1 %v2351_v37  ;;  %v1296_v33 = vld [vmem:[%s3407_s6 + $0x48] sm:$0xff]  ;;  %v2375_v34 = vpack.c.bf16 %v1140_v32, %v1138_v31  ;;  %v1298_v37 = vld [vmem:[%s3407_s6 + $0x58] sm:$0xff] }
 0x8bd   :  { %2354 = vmatprep.subr.bf16.mxu1 %v2353_v38  ;;  %v1295_v38 = vld [vmem:[%s3407_s6 + $0x40] sm:$0xff] }
 0x8c5   :  { %v2632_v44 = vpop.eup %2631 }
 0x92c   :  { %v771_v42 = vpop.permute.xlu0 %770 }
 0x92d   :  { %v773_v43 = vadd.f32 %v771_v42, %v767_v41  ;;  %v1120_v41 = vld [vmem:[%s3406_s4 + $0x30] sm:$0xff]  ;;  %v1123_v42 = vld [vmem:[%s3406_s4 + $0x48] sm:$0xff] }
 0x92f   :  { %2633 = vtanh.f32 %v773_v43 }
 0x939   :  { %v2634_v48 = vpop.eup %2633 }
 0x93a   :  { %v775_v50 = vmul.f32 %v2634_v48, %v2632_v44  ;;  %v2355_v44 = vpack.c.bf16 %v1120_v41, %v1118_v39  ;;  %v1297_v39 = vld [vmem:[%s3407_s6 + $0x50] sm:$0xff]  ;;  %v3228_v41 = vpack.c.bf16 %v1298_v37, %v1296_v33 }
 0x93c   :  { %777 = vrot.lane.b32.xlu1 %v775_v50, %s2768_s2  ;;  %781 = vst.msk [vmem:[#allocation3 + $0x18] sm:$0xff] %vm342_vm1, %v775_v50  ;;  %2356 = vmatpush1.bf16.msra.mxu1 %v2355_v44  ;;  %v1145_v44 = vld [vmem:[%s3406_s4 + $0xf8] sm:$0xff] }
 0x9ae   :  { %v778_v51 = vpop.permute.xlu1 %777 }
 0x9af   :  { %780 = vst.msk [vmem:[#allocation3 + $0x20] sm:$0xff] %vm237_vm2, %v778_v51  ;;  %2179 = vmatmul.mubr.msk.f32.vlgmr.msra.gmra.mrb[10].mxu0 %vm237_vm2, %v778_v51 }
 0x9b0   :  { %2320 = vmatpush1.bf16.msra.mxu0 %v2868_v21  ;;  %961 = vmatprep.mubr.f32.mxu0 %v2767_v3 }
 0x9b1   :  { %2322 = vmatprep.subr.bf16.mxu0 %v2871_v22 }
 0x9b4   :  { %2324 = vmatpush1.bf16.msra.mxu0 %v2891_v28 }
 0x9b5   :  { %2326 = vmatprep.subr.bf16.mxu0 %v2894_v29 }
 0x9b8   :  { %2328 = vmatpush1.bf16.msra.mxu0 %v2914_v35 }
 0x9b9   :  { %2330 = vmatprep.subr.bf16.mxu0 %v2917_v36 }
 0x9bc   :  { %2332 = vmatpush1.bf16.msra.mxu0 %v2931_v40 }
 0x9bd   :  { %2334 = vmatprep.subr.bf16.mxu0 %v2851_v15 }
 0xa82   :  { %v855_v52 = vpop.f32.mrb[10].mxu0 }
 0xa83   :  { %v2519_v53 = vadd.f32 %v855_v52, %v2977_v49  ;;  %v857_v56 = vpop.f32.mrb[11].mxu0 }
 0xa84   :  { %v2520_v58 = vadd.f32 %v857_v56, %v2983_v55 }
 0xa85   :  { %v2180_v57 = vmul.f32 -1.442695, %v2519_v53 }
 0xa86   :  { %v2181_v0 = vmul.f32 -1.442695, %v2520_v58 }
 0xa87   :  { %2635 = vpow2.f32 %v2180_v57 }
 0xa88   :  { %2637 = vtanh.f32 %v2520_v58  ;;  %v1122_v58 = vld [vmem:[%s3406_s4 + $0x40] sm:$0xff] }
 0xa91   :  { %v2636_v59 = vpop.eup %2635 }
 0xa92   :  { %v868_v60 = vadd.f32 1.0, %v2636_v59  ;;  %v2638_v61 = vpop.eup %2637  ;;  %v1124_v59 = vld [vmem:[%s3406_s4 + $0x50] sm:$0xff] }
 0xa94   :  { %2639 = vrcp.f32 %v868_v60 }
 0xa95   :  { %2641 = vpow2.f32 %v2181_v0  ;;  %v1128_v0 = vld [vmem:[%s3406_s4 + $0x70] sm:$0xff] }
 0xa9e   :  { %v2640_v62 = vpop.eup %2639 }
 0xa9f   :  { %v876_v63 = vmul.f32 %v2640_v62, %v2638_v61  ;;  %v2642_v15 = vpop.eup %2641  ;;  %v875_v2 = vmul.f32 %v2640_v62, %v773_v43  ;;  %v1125_v43 = vld [vmem:[%s3406_s4 + $0x58] sm:$0xff]  ;;  %v2359_v61 = vpack.c.bf16 %v1124_v59, %v1122_v58  ;;  %v1299_v59 = vld [vmem:[%s3407_s6 + $0x60] sm:$0xff] }
 0xaa0   :  { %v869_v1 = vadd.f32 1.0, %v2642_v15  ;;  %v2357_v48 = vpack.c.bf16 %v1125_v43, %v1123_v42  ;;  %v3230_v42 = vpack.c.bf16 %v1297_v39, %v1295_v38  ;;  %v1143_v43 = vld [vmem:[%s3406_s4 + $0xe8] sm:$0xff] }
 0xaa1   :  { %878 = vrot.lane.b32.xlu0 %v876_v63, %s2768_s2  ;;  %v1126_v63 = vld [vmem:[%s3406_s4 + $0x60] sm:$0xff] }
 0xaa2   :  { %2643 = vrcp.f32 %v869_v1  ;;  %2358 = vmatprep.subr.bf16.mxu1 %v2357_v48  ;;  %v2363_v15 = vpack.c.bf16 %v1128_v0, %v1126_v63  ;;  %v1131_v1 = vld [vmem:[%s3406_s4 + $0x88] sm:$0xff]  ;;  %v1142_v48 = vld [vmem:[%s3406_s4 + $0xe0] sm:$0xff] }
 0xaa3   :  { %2360 = vmatpush1.bf16.msra.mxu1 %v2359_v61 }
 0xaac   :  { %v2644_v6 = vpop.eup %2643 }
 0xb13   :  { %v879_v4 = vpop.permute.xlu0 %878 }
 0xb14   :  { %v881_v5 = vadd.f32 %v879_v4, %v875_v2  ;;  %v1133_v2 = vld [vmem:[%s3406_s4 + $0x98] sm:$0xff]  ;;  %v1130_v4 = vld [vmem:[%s3406_s4 + $0x80] sm:$0xff] }
 0xb16   :  { %2645 = vtanh.f32 %v881_v5 }
 0xb20   :  { %v2646_v7 = vpop.eup %2645 }
 0xb21   :  { %v883_v8 = vmul.f32 %v2646_v7, %v2644_v6  ;;  %v1132_v6 = vld [vmem:[%s3406_s4 + $0x90] sm:$0xff]  ;;  %v1288_v7 = vld [vmem:[%s3407_s6 + $0x8] sm:$0xff] }
 0xb23   :  { %885 = vrot.lane.b32.xlu1 %v883_v8, %s2768_s2  ;;  %889 = vst.msk [vmem:[#allocation3 + $0x10] sm:$0xff] %vm342_vm1, %v883_v8  ;;  %v1290_v8 = vld [vmem:[%s3407_s6 + $0x18] sm:$0xff] }
 0xb95   :  { %v886_v9 = vpop.permute.xlu1 %885 }
 0xb96   :  { %888 = vst.msk [vmem:[#allocation3 + $0x28] sm:$0xff] %vm237_vm2, %v886_v9  ;;  %2182 = vmatmul.mubr.msk.f32.vlgmr.msra.gmra.mrb[12].mxu0 %vm237_vm2, %v886_v9  ;;  %v2367_v9 = vpack.c.bf16 %v1132_v6, %v1130_v4  ;;  %v1109_v6 = vld [vmem:[#allocation3 + $0x18] sm:$0xff] }
 0xb97   :  { %2336 = vmatpush1.bf16.msra.mxu0 %v2868_v21  ;;  %1069 = vmatprep.mubr.f32.mxu0 %v2767_v3 }
 0xb98   :  { %2338 = vmatprep.subr.bf16.mxu0 %v2871_v22 }
 0xb9b   :  { %2340 = vmatpush1.bf16.msra.mxu0 %v2891_v28 }
 0xb9c   :  { %2342 = vmatprep.subr.bf16.mxu0 %v2894_v29 }
 0xb9f   :  { %2344 = vmatpush1.bf16.msra.mxu0 %v2914_v35 }
 0xba0   :  { %2346 = vmatprep.subr.bf16.mxu0 %v2917_v36 }
 0xba3   :  { %2348 = vmatpush1.bf16.msra.mxu0 %v2931_v40 }
 0xc69   :  { %v963_v10 = vpop.f32.mrb[12].mxu0 }
 0xc6a   :  { %v2521_v11 = vadd.f32 %v963_v10, %v2977_v49  ;;  %v965_v12 = vpop.f32.mrb[13].mxu0  ;;  %v3161_v10 = vpack.c.bf16 %v1290_v8, %v1288_v7  ;;  %v1110_v7 = vld [vmem:[#allocation3 + $0x20] sm:$0xff]  ;;  %v1111_v8 = vld [vmem:[#allocation3 + $0x28] sm:$0xff] }
 0xc6b   :  { %v2522_v21 = vadd.f32 %v965_v12, %v2983_v55  ;;  %v1289_v12 = vld [vmem:[%s3407_s6 + $0x10] sm:$0xff] }
 0xc6c   :  { %v2183_v13 = vmul.f32 -1.442695, %v2521_v11  ;;  %v1287_v11 = vld [vmem:[%s3407_s6] sm:$0xff]  ;;  %2382 = vmatprep.subr.bf16.mxu0 %v3161_v10 }
 0xc6d   :  { %v2184_v35 = vmul.f32 -1.442695, %v2522_v21 }
 0xc6e   :  { %2647 = vpow2.f32 %v2183_v13  ;;  %v1135_v13 = vld [vmem:[%s3406_s4 + $0xa8] sm:$0xff] }
 0xc6f   :  { %2649 = vtanh.f32 %v2522_v21  ;;  %v3172_v21 = vpack.c.bf16 %v1289_v12, %v1287_v11 }
 0xc78   :  { %v2648_v14 = vpop.eup %2647 }
 0xc79   :  { %v976_v22 = vadd.f32 1.0, %v2648_v14  ;;  %v2650_v28 = vpop.eup %2649  ;;  %v1137_v14 = vld [vmem:[%s3406_s4 + $0xb8] sm:$0xff] }
 0xc7b   :  { %2651 = vrcp.f32 %v976_v22  ;;  %v1134_v22 = vld [vmem:[%s3406_s4 + $0xa0] sm:$0xff] }
 0xc7c   :  { %2653 = vpow2.f32 %v2184_v35  ;;  %v1294_v35 = vld [vmem:[%s3407_s6 + $0x38] sm:$0xff] }
 0xc85   :  { %v2652_v29 = vpop.eup %2651 }
 0xc86   :  { %v984_v16 = vmul.f32 %v2652_v29, %v2650_v28  ;;  %v2654_v36 = vpop.eup %2653  ;;  %v983_v17 = vmul.f32 %v2652_v29, %v881_v5  ;;  %v2365_v5 = vpack.c.bf16 %v1133_v2, %v1131_v1  ;;  %v1136_v28 = vld [vmem:[%s3406_s4 + $0xb0] sm:$0xff]  ;;  %v2369_v29 = vpack.c.bf16 %v1137_v14, %v1135_v13 }
 0xc87   :  { %v977_v40 = vadd.f32 1.0, %v2654_v36  ;;  %v1291_v36 = vld [vmem:[%s3407_s6 + $0x20] sm:$0xff] }
 0xc88   :  { %986 = vrot.lane.b32.xlu0 %v984_v16, %s2768_s2  ;;  %v1292_v16 = vld [vmem:[%s3407_s6 + $0x28] sm:$0xff] }
 0xc89   :  { %2655 = vrcp.f32 %v977_v40  ;;  %v3194_v40 = vpack.c.bf16 %v1294_v35, %v1292_v16 }
 0xc93   :  { %v2656_v20 = vpop.eup %2655 }
 0xcfa   :  { %v987_v18 = vpop.permute.xlu0 %986 }
 0xcfb   :  { %v3082_v19 = vadd.f32 %v987_v18, %v983_v17  ;;  %v1293_v17 = vld [vmem:[%s3407_s6 + $0x30] sm:$0xff]  ;;  %v1139_v18 = vld [vmem:[%s3406_s4 + $0xc8] sm:$0xff] }
 0xcfd   :  { %2657 = vtanh.f32 %v3082_v19 }
 0xd07   :  { %v2658_v23 = vpop.eup %2657 }
 0xd08   :  { %v991_v24 = vmul.f32 %v2658_v23, %v2656_v20  ;;  %v1141_v20 = vld [vmem:[%s3406_s4 + $0xd8] sm:$0xff]  ;;  %v2371_v23 = vpack.c.bf16 %v1136_v28, %v1134_v22  ;;  %v1146_v22 = vld [vmem:[%s3408_s5] sm:$0x3] }
 0xd09   :  { %v2373_v26 = vpack.c.bf16 %v1141_v20, %v1139_v18  ;;  %v3292_v28 = vrot.slane %v1146_v22, %v54_v47 }
 0xd0a   :  { %993 = vrot.lane.b32.xlu1 %v991_v24, %s2768_s2  ;;  %997 = vst.msk [vmem:[#allocation3 + $0x8] sm:$0xff] %vm342_vm1, %v991_v24  ;;  %v3205_v24 = vpack.c.bf16 %v1293_v17, %v1291_v36 }
 0xd7c   :  { %v994_v25 = vpop.permute.xlu1 %993 }
 0xd7d   :  { %996 = vst.msk [vmem:[#allocation3 + $0x30] sm:$0xff] %vm237_vm2, %v994_v25  ;;  %2185 = vmatmul.mubr.msk.f32.vlgmr.msra.gmra.mrb[14].mxu0 %vm237_vm2, %v994_v25 }
 0xd7e   :  { %1369 = vmatprep.mubr.f32.mxu0 %v2767_v3  ;;  %2384 = vmatpush1.bf16.msra.mxu0 %v3172_v21 }
 0xd7f   :  { %2386 = vmatprep.subr.bf16.mxu0 %v3194_v40 }
 0xd82   :  { %2388 = vmatpush1.bf16.msra.mxu0 %v3205_v24 }
 0xd83   :  { %2390 = vmatprep.subr.bf16.mxu0 %v3228_v41 }
 0xd86   :  { %2392 = vmatpush1.bf16.msra.mxu0 %v3230_v42 }
 0xe50   :  { %v1071_v50 = vpop.f32.mrb[14].mxu0 }
 0xe51   :  { %v2523_v51 = vadd.f32 %v1071_v50, %v2977_v49  ;;  %v1073_v52 = vpop.f32.mrb[15].mxu0  ;;  %v1127_v49 = vld [vmem:[%s3406_s4 + $0x68] sm:$0xff]  ;;  %v2377_v50 = vpack.c.bf16 %v1145_v44, %v1143_v43 }
 0xe52   :  { %v3122_v56 = vadd.f32 %v1073_v52, %v2983_v55  ;;  %v1129_v55 = vld [vmem:[%s3406_s4 + $0x78] sm:$0xff]  ;;  %v1300_v52 = vld [vmem:[%s3407_s6 + $0x68] sm:$0xff] }
 0xe53   :  { %v2186_v53 = vmul.f32 -1.442695, %v2523_v51  ;;  %v2361_v62 = vpack.c.bf16 %v1129_v55, %v1127_v49  ;;  %v1144_v51 = vld [vmem:[%s3406_s4 + $0xf0] sm:$0xff] }
 0xe54   :  { %v2187_v49 = vmul.f32 -1.442695, %v3122_v56 }
 0xe55   :  { %2659 = vpow2.f32 %v2186_v53  ;;  %2362 = vmatprep.subr.bf16.mxu1 %v2361_v62  ;;  %v1302_v53 = vld [vmem:[%s3407_s6 + $0x78] sm:$0xff] }
 0xe56   :  { %2661 = vtanh.f32 %v3122_v56  ;;  %2364 = vmatpush1.bf16.msra.mxu1 %v2363_v15  ;;  %v3251_v58 = vpack.c.bf16 %v1302_v53, %v1300_v52  ;;  %v1108_v56 = vld [vmem:[#allocation3 + $0x10] sm:$0xff] }
 0xe57   :  { %2366 = vmatprep.subr.bf16.mxu1 %v2365_v5 }
 0xe58   :  { %2394 = vmatprep.subr.bf16.mxu0 %v3251_v58 }
 0xe5a   :  { %2368 = vmatpush1.bf16.msra.mxu1 %v2367_v9  ;;  %v1112_v9 = vld [vmem:[#allocation3 + $0x30] sm:$0xff] }
 0xe5b   :  { %2370 = vmatprep.subr.bf16.mxu1 %v2369_v29  ;;  %v3296_v29 = vrot.slane %v1146_v22, %v58_v54 }
 0xe5e   :  { %2372 = vmatpush1.bf16.msra.mxu1 %v2371_v23 }
 0xe5f   :  { %v2660_v57 = vpop.eup %2659  ;;  %2374 = vmatprep.subr.bf16.mxu1 %v2373_v26 }
 0xe60   :  { %v1084_v60 = vadd.f32 1.0, %v2660_v57  ;;  %v2662_v25 = vpop.eup %2661  ;;  %v2379_v57 = vpack.c.bf16 %v1144_v51, %v1142_v48 }
 0xe62   :  { %2663 = vrcp.f32 %v1084_v60  ;;  %2376 = vmatpush1.bf16.msra.mxu1 %v2375_v34  ;;  %v1301_v60 = vld [vmem:[%s3407_s6 + $0x70] sm:$0xff] }
 0xe63   :  { %2378 = vmatprep.subr.bf16.mxu1 %v2377_v50  ;;  %v3260_v61 = vpack.c.bf16 %v1301_v60, %v1299_v59  ;;  %2665 = vpow2.f32 %v2187_v49 }
 0xe65   :  { %2396 = vmatpush1.bf16.msra.mxu0 %v3260_v61 }
 0xe66   :  { %2380 = vmatpush1.bf16.msra.mxu1 %v2379_v57 }
 0xe67   :  { %2398 = vmatprep.subr.bf16.mxu1 %v3161_v10 }
 0xe68   :  { %1370 = vmatmul.mubr.f32.vlgmr.msra.gmra.mrb[16].mxu0 %v2767_v3 }
 0xe6c   :  { %v2664_v27 = vpop.eup %2663 }
 0xe6d   :  { %v1092_v30 = vmul.f32 %v2664_v27, %v2662_v25  ;;  %v2666_v55 = vpop.eup %2665  ;;  %v1091_v63 = vmul.f32 %v2664_v27, %v3082_v19  ;;  %v1107_v19 = vld [vmem:[#allocation3 + $0x8] sm:$0xff] }
 0xe6e   :  { %v1085_v62 = vadd.f32 1.0, %v2666_v55 }
 0xe6f   :  { %1094 = vrot.lane.b32.xlu0 %v1092_v30, %s2768_s2 }
 0xe70   :  { %2667 = vrcp.f32 %v1085_v62 }
 0xe7a   :  { %v2668_v1 = vpop.eup %2667 }
 0xee1   :  { %v1095_v0 = vpop.permute.xlu0 %1094 }
 0xee2   :  { %v1097_v15 = vadd.f32 %v1095_v0, %v1091_v63 }
 0xee4   :  { %2669 = vtanh.f32 %v1097_v15 }
 0xeee   :  { %v2670_v2 = vpop.eup %2669 }
 0xeef   :  { %v1099_v4 = vmul.f32 %v2670_v2, %v2668_v1 }
 0xef1   :  { %1101 = vrot.lane.b32.xlu0 %v1099_v4, %s2768_s2  ;;  %1105 = vst.msk [vmem:[#allocation3] sm:$0xff] %vm342_vm1, %v1099_v4 }
 0xef8   :  { %v1106_v5 = vld [vmem:[#allocation3] sm:$0xff] }
 0xef9   :  { %1223 = vmatmul.mubr.f32.vlgmr.msra.gmra.mrb[0].mxu1 %v1106_v5 }
 0xefa   :  { %1228 = vmatprep.mubr.f32.mxu1 %v2767_v3  ;;  %2400 = vmatpush1.bf16.msra.mxu1 %v3172_v21 }
 0xefb   :  { %2402 = vmatprep.subr.bf16.mxu1 %v3194_v40 }
 0xefd   :  { %1229 = vmatmul.mubr.f32.gmra.mrb[2].mxu1 %v1107_v19 }
 0xefe   :  { %1234 = vmatprep.mubr.f32.mxu1 %v2767_v3  ;;  %2404 = vmatpush1.bf16.msra.mxu1 %v3205_v24 }
 0xeff   :  { %2406 = vmatprep.subr.bf16.mxu1 %v3228_v41 }
 0xf01   :  { %1235 = vmatmul.mubr.f32.gmra.mrb[4].mxu1 %v1108_v56 }
 0xf02   :  { %1240 = vmatprep.mubr.f32.mxu1 %v2767_v3  ;;  %2408 = vmatpush1.bf16.msra.mxu1 %v3230_v42 }
 0xf03   :  { %2410 = vmatprep.subr.bf16.mxu1 %v3251_v58 }
 0xf05   :  { %1241 = vmatmul.mubr.f32.gmra.mrb[6].mxu1 %v1109_v6 }
 0xf06   :  { %1246 = vmatprep.mubr.f32.mxu1 %v2767_v3  ;;  %2412 = vmatpush1.bf16.msra.mxu1 %v3260_v61 }
 0xf07   :  { %2414 = vmatprep.subr.bf16.mxu1 %v3161_v10 }
 0xf09   :  { %1247 = vmatmul.mubr.f32.gmra.mrb[8].mxu1 %v1110_v7 }
 0xf0a   :  { %1252 = vmatprep.mubr.f32.mxu1 %v2767_v3 }
 0xf0d   :  { %1253 = vmatmul.mubr.f32.gmra.mrb[10].mxu1 %v1111_v8 }
 0xf0e   :  { %1258 = vmatprep.mubr.f32.mxu1 %v2767_v3 }
 0xf11   :  { %1259 = vmatmul.mubr.f32.gmra.mrb[12].mxu1 %v1112_v9 }
 0xf12   :  { %1264 = vmatprep.mubr.f32.mxu1 %v2767_v3 }
 0xf3b   :  { %v1371_v11 = vpop.f32.mrb[16].mxu0 }
 0xf3c   :  { %v1373_v12 = vpop.f32.mrb[17].mxu0 }
 0xf63   :  { %v1102_v13 = vpop.permute.xlu0 %1101 }
 0xf64   :  { %1104 = vst.msk [vmem:[#allocation3 + $0x38] sm:$0xff] %vm237_vm2, %v1102_v13 }
 0xf6b   :  { %v1113_v14 = vld [vmem:[#allocation3 + $0x38] sm:$0xff] }
 0xf6c   :  { %1265 = vmatmul.mubr.f32.gmra.mrb[14].mxu1 %v1113_v14 }
 0xf6d   :  { %1473 = vmatprep.mubr.f32.mxu1 %v2767_v3 }
 0xfcc   :  { %v1224_v16 = vpop.f32.mrb[0].mxu1 }
 0xfcd   :  { %v1225_v35 = vadd.f32 %v1224_v16, %v3292_v28  ;;  %v1226_v36 = vpop.f32.mrb[1].mxu1 }
 0xfce   :  { %v1227_v17 = vadd.f32 %v1226_v36, %v3296_v29 }
 0xfcf   :  { %v1376_v18 = vadd.f32 %v1371_v11, %v1225_v35 }
 0xfd0   :  { %v1377_v20 = vadd.f32 %v1373_v12, %v1227_v17 }
 0xfd1   :  { %v2188_v23 = vmul.f32 -1.442695, %v1376_v18 }
 0xfd2   :  { %v2189_v46 = vmul.f32 -1.442695, %v1377_v20 }
 0xfd3   :  { %2671 = vpow2.f32 %v2188_v23 }
 0xfd4   :  { %2673 = vtanh.f32 %v1377_v20 }
 0xfdd   :  { %v2672_v25 = vpop.eup %2671 }
 0xfde   :  { %v1384_v26 = vadd.f32 1.0, %v2672_v25  ;;  %v2674_v47 = vpop.eup %2673 }
 0xfe0   :  { %2675 = vrcp.f32 %v1384_v26 }
 0xfe1   :  { %2677 = vpow2.f32 %v2189_v46 }
 0xfea   :  { %v2676_v27 = vpop.eup %2675 }
 0xfeb   :  { %v1392_v30 = vmul.f32 %v2676_v27, %v2674_v47  ;;  %v2678_v54 = vpop.eup %2677  ;;  %v1391_v32 = vmul.f32 0.0, %v2676_v27 }
 0xfec   :  { %v1385_v31 = vadd.f32 1.0, %v2678_v54 }
 0xfed   :  { %1394 = vrot.lane.b32.xlu1 %v1392_v30, %s2768_s2 }
 0xfee   :  { %2679 = vrcp.f32 %v1385_v31 }
 0xff8   :  { %v2680_v37 = vpop.eup %2679 }
0x105f   :  { %v1395_v33 = vpop.permute.xlu1 %1394 }
0x1060   :  { %v1397_v34 = vadd.f32 %v1395_v33, %v1391_v32 }
0x1062   :  { %2681 = vtanh.f32 %v1397_v34 }
0x106c   :  { %v2682_v38 = vpop.eup %2681 }
0x106d   :  { %v1399_v39 = vmul.f32 %v2682_v38, %v2680_v37 }
0x106f   :  { %1401 = vrot.lane.b32.xlu1 %v1399_v39, %s2768_s2 }
0x10e1   :  { %v1402_v43 = vpop.permute.xlu1 %1401 }
0x10e2   :  { %1404 = vst.msk [vmem:[#allocation4] sm:$0xff] %vm237_vm2, %v1402_v43  ;;  %2190 = vmatmul.mubr.msk.f32.vlgmr.msra.gmra.mrb[2].mxu1 %vm237_vm2, %v1402_v43 }
0x10e3   :  { %2416 = vmatpush1.bf16.msra.mxu1 %v3172_v21  ;;  %1575 = vmatprep.mubr.f32.mxu1 %v2767_v3 }
0x10e4   :  { %2418 = vmatprep.subr.bf16.mxu1 %v3194_v40 }
0x10e7   :  { %2420 = vmatpush1.bf16.msra.mxu1 %v3205_v24 }
0x10e8   :  { %2422 = vmatprep.subr.bf16.mxu1 %v3228_v41 }
0x10eb   :  { %2424 = vmatpush1.bf16.msra.mxu1 %v3230_v42 }
0x10ec   :  { %2426 = vmatprep.subr.bf16.mxu1 %v3251_v58 }
0x10ef   :  { %2428 = vmatpush1.bf16.msra.mxu1 %v3260_v61 }
0x10f0   :  { %2430 = vmatprep.subr.bf16.mxu1 %v3161_v10 }
0x11b5   :  { %v1475_v44 = vpop.f32.mrb[2].mxu1 }
0x11b6   :  { %v2529_v48 = vadd.f32 %v1475_v44, %v3292_v28  ;;  %v1477_v50 = vpop.f32.mrb[3].mxu1 }
0x11b7   :  { %v2530_v52 = vadd.f32 %v1477_v50, %v3296_v29 }
0x11b8   :  { %v2191_v51 = vmul.f32 -1.442695, %v2529_v48 }
0x11b9   :  { %v2192_v55 = vmul.f32 -1.442695, %v2530_v52 }
0x11ba   :  { %2683 = vpow2.f32 %v2191_v51 }
0x11bb   :  { %2685 = vtanh.f32 %v2530_v52 }
0x11c4   :  { %v2684_v53 = vpop.eup %2683 }
0x11c5   :  { %v1488_v57 = vadd.f32 1.0, %v2684_v53  ;;  %v2686_v59 = vpop.eup %2685 }
0x11c7   :  { %2687 = vrcp.f32 %v1488_v57 }
0x11c8   :  { %2689 = vpow2.f32 %v2192_v55 }
0x11d1   :  { %v2688_v60 = vpop.eup %2687 }
0x11d2   :  { %v1496_v49 = vmul.f32 %v2688_v60, %v2686_v59  ;;  %v2690_v62 = vpop.eup %2689  ;;  %v1495_v0 = vmul.f32 %v2688_v60, %v1397_v34 }
0x11d3   :  { %v1489_v63 = vadd.f32 1.0, %v2690_v62 }
0x11d4   :  { %1498 = vrot.lane.b32.xlu0 %v1496_v49, %s2768_s2 }
0x11d5   :  { %2691 = vrcp.f32 %v1489_v63 }
0x11df   :  { %v2692_v2 = vpop.eup %2691 }
0x1246   :  { %v1499_v15 = vpop.permute.xlu0 %1498 }
0x1247   :  { %v1501_v1 = vadd.f32 %v1499_v15, %v1495_v0 }
0x1249   :  { %2693 = vtanh.f32 %v1501_v1 }
0x1253   :  { %v2694_v4 = vpop.eup %2693 }
0x1254   :  { %v1503_v5 = vmul.f32 %v2694_v4, %v2692_v2 }
0x1256   :  { %1507 = vrot.lane.b32.xlu1 %v1503_v5, %s2768_s2 }
0x12c8   :  { %v1508_v19 = vpop.permute.xlu1 %1507 }
0x12c9   :  { %2193 = vmatmul.mubr.msk.f32.vlgmr.msra.gmra.mrb[4].mxu1 %vm237_vm2, %v1508_v19 }
0x12ca   :  { %2432 = vmatpush1.bf16.msra.mxu1 %v3172_v21  ;;  %1677 = vmatprep.mubr.f32.mxu1 %v2767_v3 }
0x12cb   :  { %2434 = vmatprep.subr.bf16.mxu1 %v3194_v40 }
0x12ce   :  { %2436 = vmatpush1.bf16.msra.mxu1 %v3205_v24 }
0x12cf   :  { %2438 = vmatprep.subr.bf16.mxu1 %v3228_v41 }
0x12d2   :  { %2440 = vmatpush1.bf16.msra.mxu1 %v3230_v42 }
0x12d3   :  { %2442 = vmatprep.subr.bf16.mxu1 %v3251_v58 }
0x12d6   :  { %2444 = vmatpush1.bf16.msra.mxu1 %v3260_v61 }
0x12d7   :  { %2446 = vmatprep.subr.bf16.mxu1 %v3161_v10 }
0x139c   :  { %v1577_v56 = vpop.f32.mrb[4].mxu1 }
0x139d   :  { %v2531_v6 = vadd.f32 %v1577_v56, %v3292_v28  ;;  %v1579_v7 = vpop.f32.mrb[5].mxu1 }
0x139e   :  { %v2532_v9 = vadd.f32 %v1579_v7, %v3296_v29 }
0x139f   :  { %v2194_v8 = vmul.f32 -1.442695, %v2531_v6 }
0x13a0   :  { %v2195_v16 = vmul.f32 -1.442695, %v2532_v9 }
0x13a1   :  { %2695 = vpow2.f32 %v2194_v8 }
0x13a2   :  { %2697 = vtanh.f32 %v2532_v9 }
0x13ab   :  { %v2696_v11 = vpop.eup %2695 }
0x13ac   :  { %v1590_v12 = vadd.f32 1.0, %v2696_v11  ;;  %v2698_v13 = vpop.eup %2697 }
0x13ae   :  { %2699 = vrcp.f32 %v1590_v12 }
0x13af   :  { %2701 = vpow2.f32 %v2195_v16 }
0x13b8   :  { %v2700_v14 = vpop.eup %2699 }
0x13b9   :  { %v1598_v22 = vmul.f32 %v2700_v14, %v2698_v13  ;;  %v2702_v35 = vpop.eup %2701  ;;  %v1597_v17 = vmul.f32 %v2700_v14, %v1501_v1 }
0x13ba   :  { %v1591_v36 = vadd.f32 1.0, %v2702_v35 }
0x13bb   :  { %1600 = vrot.lane.b32.xlu0 %v1598_v22, %s2768_s2 }
0x13bc   :  { %2703 = vrcp.f32 %v1591_v36 }
0x13c6   :  { %v2704_v23 = vpop.eup %2703 }
0x142d   :  { %v1601_v18 = vpop.permute.xlu0 %1600 }
0x142e   :  { %v1603_v20 = vadd.f32 %v1601_v18, %v1597_v17 }
0x1430   :  { %2705 = vtanh.f32 %v1603_v20 }
0x143a   :  { %v2706_v25 = vpop.eup %2705 }
0x143b   :  { %v1605_v26 = vmul.f32 %v2706_v25, %v2704_v23 }
0x143d   :  { %1609 = vrot.lane.b32.xlu1 %v1605_v26, %s2768_s2 }
0x14af   :  { %v1610_v47 = vpop.permute.xlu1 %1609 }
0x14b0   :  { %2196 = vmatmul.mubr.msk.f32.vlgmr.msra.gmra.mrb[6].mxu1 %vm237_vm2, %v1610_v47 }
0x14b1   :  { %2448 = vmatpush1.bf16.msra.mxu1 %v3172_v21  ;;  %1779 = vmatprep.mubr.f32.mxu1 %v2767_v3 }
0x14b2   :  { %2450 = vmatprep.subr.bf16.mxu1 %v3194_v40 }
0x14b5   :  { %2452 = vmatpush1.bf16.msra.mxu1 %v3205_v24 }
0x14b6   :  { %2454 = vmatprep.subr.bf16.mxu1 %v3228_v41 }
0x14b9   :  { %2456 = vmatpush1.bf16.msra.mxu1 %v3230_v42 }
0x14ba   :  { %2458 = vmatprep.subr.bf16.mxu1 %v3251_v58 }
0x14bd   :  { %2460 = vmatpush1.bf16.msra.mxu1 %v3260_v61 }
0x14be   :  { %2462 = vmatprep.subr.bf16.mxu1 %v3161_v10 }
0x1583   :  { %v1679_v27 = vpop.f32.mrb[6].mxu1 }
0x1584   :  { %v2533_v30 = vadd.f32 %v1679_v27, %v3292_v28  ;;  %v1681_v46 = vpop.f32.mrb[7].mxu1 }
0x1585   :  { %v2534_v31 = vadd.f32 %v1681_v46, %v3296_v29 }
0x1586   :  { %v2197_v54 = vmul.f32 -1.442695, %v2533_v30 }
0x1587   :  { %v2198_v39 = vmul.f32 -1.442695, %v2534_v31 }
0x1588   :  { %2707 = vpow2.f32 %v2197_v54 }
0x1589   :  { %2709 = vtanh.f32 %v2534_v31 }
0x1592   :  { %v2708_v32 = vpop.eup %2707 }
0x1593   :  { %v1692_v33 = vadd.f32 1.0, %v2708_v32  ;;  %v2710_v34 = vpop.eup %2709 }
0x1595   :  { %2711 = vrcp.f32 %v1692_v33 }
0x1596   :  { %2713 = vpow2.f32 %v2198_v39 }
0x159f   :  { %v2712_v37 = vpop.eup %2711 }
0x15a0   :  { %v1700_v38 = vmul.f32 %v2712_v37, %v2710_v34  ;;  %v2714_v43 = vpop.eup %2713  ;;  %v1699_v48 = vmul.f32 %v2712_v37, %v1603_v20 }
0x15a1   :  { %v1693_v44 = vadd.f32 1.0, %v2714_v43 }
0x15a2   :  { %1702 = vrot.lane.b32.xlu0 %v1700_v38, %s2768_s2 }
0x15a3   :  { %2715 = vrcp.f32 %v1693_v44 }
0x15ad   :  { %v2716_v52 = vpop.eup %2715 }
0x1614   :  { %v1703_v50 = vpop.permute.xlu0 %1702 }
0x1615   :  { %v1705_v51 = vadd.f32 %v1703_v50, %v1699_v48 }
0x1617   :  { %2717 = vtanh.f32 %v1705_v51 }
0x1621   :  { %v2718_v53 = vpop.eup %2717 }
0x1622   :  { %v1707_v57 = vmul.f32 %v2718_v53, %v2716_v52 }
0x1624   :  { %1711 = vrot.lane.b32.xlu1 %v1707_v57, %s2768_s2 }
0x1696   :  { %v1712_v59 = vpop.permute.xlu1 %1711 }
0x1697   :  { %2199 = vmatmul.mubr.msk.f32.vlgmr.msra.gmra.mrb[8].mxu1 %vm237_vm2, %v1712_v59 }
0x1698   :  { %2464 = vmatpush1.bf16.msra.mxu1 %v3172_v21  ;;  %1881 = vmatprep.mubr.f32.mxu1 %v2767_v3 }
0x1699   :  { %2466 = vmatprep.subr.bf16.mxu1 %v3194_v40 }
0x169c   :  { %2468 = vmatpush1.bf16.msra.mxu1 %v3205_v24 }
0x169d   :  { %2470 = vmatprep.subr.bf16.mxu1 %v3228_v41 }
0x16a0   :  { %2472 = vmatpush1.bf16.msra.mxu1 %v3230_v42 }
0x16a1   :  { %2474 = vmatprep.subr.bf16.mxu1 %v3251_v58 }
0x16a4   :  { %2476 = vmatpush1.bf16.msra.mxu1 %v3260_v61 }
0x16a5   :  { %2478 = vmatprep.subr.bf16.mxu1 %v3161_v10 }
0x176a   :  { %v1781_v60 = vpop.f32.mrb[8].mxu1 }
0x176b   :  { %v2535_v49 = vadd.f32 %v1781_v60, %v3292_v28  ;;  %v1783_v55 = vpop.f32.mrb[9].mxu1 }
0x176c   :  { %v2536_v63 = vadd.f32 %v1783_v55, %v3296_v29 }
0x176d   :  { %v2200_v62 = vmul.f32 -1.442695, %v2535_v49 }
0x176e   :  { %v2201_v5 = vmul.f32 -1.442695, %v2536_v63 }
0x176f   :  { %2719 = vpow2.f32 %v2200_v62 }
0x1770   :  { %2721 = vtanh.f32 %v2536_v63 }
0x1779   :  { %v2720_v0 = vpop.eup %2719 }
0x177a   :  { %v1794_v15 = vadd.f32 1.0, %v2720_v0  ;;  %v2722_v1 = vpop.eup %2721 }
0x177c   :  { %2723 = vrcp.f32 %v1794_v15 }
0x177d   :  { %2725 = vpow2.f32 %v2201_v5 }
0x1786   :  { %v2724_v2 = vpop.eup %2723 }
0x1787   :  { %v1802_v4 = vmul.f32 %v2724_v2, %v2722_v1  ;;  %v2726_v19 = vpop.eup %2725  ;;  %v1801_v6 = vmul.f32 %v2724_v2, %v1705_v51 }
0x1788   :  { %v1795_v56 = vadd.f32 1.0, %v2726_v19 }
0x1789   :  { %1804 = vrot.lane.b32.xlu0 %v1802_v4, %s2768_s2 }
0x178a   :  { %2727 = vrcp.f32 %v1795_v56 }
0x1794   :  { %v2728_v9 = vpop.eup %2727 }
0x17fb   :  { %v1805_v7 = vpop.permute.xlu0 %1804 }
0x17fc   :  { %v1807_v8 = vadd.f32 %v1805_v7, %v1801_v6 }
0x17fe   :  { %2729 = vtanh.f32 %v1807_v8 }
0x1808   :  { %v2730_v11 = vpop.eup %2729 }
0x1809   :  { %v1809_v12 = vmul.f32 %v2730_v11, %v2728_v9  ;;  %v2117_v11 = vand.u32 127, %v52_v45 }
0x180b   :  { %1813 = vrot.lane.b32.xlu1 %v1809_v12, %s2768_s2  ;;  %vm2118_vm3 = vcmp.lt.s32.totalorder %v2117_v11, 32  ;;  %v2211_v12 = vld [vmem:[%s3410_s7] ss:$0 sm:$0xff] }
0x187d   :  { %v1814_v13 = vpop.permute.xlu1 %1813 }
0x187e   :  { %2202 = vmatmul.mubr.msk.f32.vlgmr.msra.gmra.mrb[10].mxu1 %vm237_vm2, %v1814_v13  ;;  %v2119_v13 = vld [vmem:[#allocation4] sm:$0xff] }
0x187f   :  { %2480 = vmatpush1.bf16.msra.mxu1 %v3172_v21  ;;  %1983 = vmatprep.mubr.f32.mxu1 %v2767_v3 }
0x1880   :  { %2482 = vmatprep.subr.bf16.mxu1 %v3194_v40 }
0x1883   :  { %2484 = vmatpush1.bf16.msra.mxu1 %v3205_v24 }
0x1884   :  { %2486 = vmatprep.subr.bf16.mxu1 %v3228_v41 }
0x1887   :  { %2488 = vmatpush1.bf16.msra.mxu1 %v3230_v42 }
0x1888   :  { %2490 = vmatprep.subr.bf16.mxu1 %v3251_v58 }
0x188b   :  { %2492 = vmatpush1.bf16.msra.mxu1 %v3260_v61 }
0x188c   :  { %2494 = vmatprep.subr.bf16.mxu1 %v3161_v10 }
0x1951   :  { %v1883_v14 = vpop.f32.mrb[10].mxu1 }
0x1952   :  { %v2537_v22 = vadd.f32 %v1883_v14, %v3292_v28  ;;  %v1885_v16 = vpop.f32.mrb[11].mxu1 }
0x1953   :  { %v2538_v36 = vadd.f32 %v1885_v16, %v3296_v29 }
0x1954   :  { %v2203_v35 = vmul.f32 -1.442695, %v2537_v22 }
0x1955   :  { %v2204_v26 = vmul.f32 -1.442695, %v2538_v36 }
0x1956   :  { %2731 = vpow2.f32 %v2203_v35 }
0x1957   :  { %2733 = vtanh.f32 %v2538_v36 }
0x1960   :  { %v2732_v17 = vpop.eup %2731 }
0x1961   :  { %v1896_v18 = vadd.f32 1.0, %v2732_v17  ;;  %v2734_v20 = vpop.eup %2733 }
0x1963   :  { %2735 = vrcp.f32 %v1896_v18 }
0x1964   :  { %2737 = vpow2.f32 %v2204_v26 }
0x196d   :  { %v2736_v23 = vpop.eup %2735 }
0x196e   :  { %v1904_v25 = vmul.f32 %v2736_v23, %v2734_v20  ;;  %v2738_v10 = vpop.eup %2737  ;;  %v1903_v27 = vmul.f32 %v2736_v23, %v1807_v8 }
0x196f   :  { %v1897_v47 = vadd.f32 1.0, %v2738_v10 }
0x1970   :  { %1906 = vrot.lane.b32.xlu0 %v1904_v25, %s2768_s2 }
0x1971   :  { %2739 = vrcp.f32 %v1897_v47 }
0x197b   :  { %v2740_v54 = vpop.eup %2739 }
0x19e2   :  { %v1907_v30 = vpop.permute.xlu0 %1906 }
0x19e3   :  { %v1909_v46 = vadd.f32 %v1907_v30, %v1903_v27 }
0x19e5   :  { %2741 = vtanh.f32 %v1909_v46 }
0x19ef   :  { %v2742_v31 = vpop.eup %2741 }
0x19f0   :  { %v1911_v32 = vmul.f32 %v2742_v31, %v2740_v54 }
0x19f2   :  { %1915 = vrot.lane.b32.xlu1 %v1911_v32, %s2768_s2 }
0x1a64   :  { %v1916_v33 = vpop.permute.xlu1 %1915 }
0x1a65   :  { %2205 = vmatmul.mubr.msk.f32.vlgmr.msra.gmra.mrb[12].mxu1 %vm237_vm2, %v1916_v33 }
0x1a66   :  { %2496 = vmatpush1.bf16.msra.mxu1 %v3172_v21  ;;  %2085 = vmatprep.mubr.f32.mxu1 %v2767_v3 }
0x1a67   :  { %2498 = vmatprep.subr.bf16.mxu1 %v3194_v40 }
0x1a6a   :  { %2500 = vmatpush1.bf16.msra.mxu1 %v3205_v24 }
0x1a6b   :  { %2502 = vmatprep.subr.bf16.mxu1 %v3228_v41 }
0x1a6e   :  { %2504 = vmatpush1.bf16.msra.mxu1 %v3230_v42 }
0x1a6f   :  { %2506 = vmatprep.subr.bf16.mxu1 %v3251_v58 }
0x1a72   :  { %2508 = vmatpush1.bf16.msra.mxu1 %v3260_v61 }
0x1b38   :  { %v1985_v34 = vpop.f32.mrb[12].mxu1 }
0x1b39   :  { %v2539_v37 = vadd.f32 %v1985_v34, %v3292_v28  ;;  %v1987_v38 = vpop.f32.mrb[13].mxu1 }
0x1b3a   :  { %v2540_v3 = vadd.f32 %v1987_v38, %v3296_v29 }
0x1b3b   :  { %v2206_v39 = vmul.f32 -1.442695, %v2539_v37 }
0x1b3c   :  { %v2207_v42 = vmul.f32 -1.442695, %v2540_v3 }
0x1b3d   :  { %2743 = vpow2.f32 %v2206_v39 }
0x1b3e   :  { %2745 = vtanh.f32 %v2540_v3 }
0x1b47   :  { %v2744_v21 = vpop.eup %2743 }
0x1b48   :  { %v1998_v40 = vadd.f32 1.0, %v2744_v21  ;;  %v2746_v24 = vpop.eup %2745 }
0x1b4a   :  { %2747 = vrcp.f32 %v1998_v40 }
0x1b4b   :  { %2749 = vpow2.f32 %v2207_v42 }
0x1b54   :  { %v2748_v41 = vpop.eup %2747 }
0x1b55   :  { %v2006_v43 = vmul.f32 %v2748_v41, %v2746_v24  ;;  %v2750_v58 = vpop.eup %2749  ;;  %v2005_v44 = vmul.f32 %v2748_v41, %v1909_v46 }
0x1b56   :  { %v1999_v61 = vadd.f32 1.0, %v2750_v58 }
0x1b57   :  { %2008 = vrot.lane.b32.xlu0 %v2006_v43, %s2768_s2 }
0x1b58   :  { %2751 = vrcp.f32 %v1999_v61 }
0x1b62   :  { %v2752_v51 = vpop.eup %2751 }
0x1bc9   :  { %v2009_v48 = vpop.permute.xlu0 %2008 }
0x1bca   :  { %v2011_v50 = vadd.f32 %v2009_v48, %v2005_v44 }
0x1bcc   :  { %2753 = vtanh.f32 %v2011_v50 }
0x1bd6   :  { %v2754_v52 = vpop.eup %2753 }
0x1bd7   :  { %v2013_v53 = vmul.f32 %v2754_v52, %v2752_v51 }
0x1bd9   :  { %2017 = vrot.lane.b32.xlu1 %v2013_v53, %s2768_s2 }
0x1c4b   :  { %v2018_v57 = vpop.permute.xlu1 %2017 }
0x1c4c   :  { %2208 = vmatmul.mubr.msk.f32.vlgmr.msra.gmra.mrb[14].mxu1 %vm237_vm2, %v2018_v57 }
0x1d1f   :  { %v2087_v59 = vpop.f32.mrb[14].mxu1 }
0x1d20   :  { %v2541_v60 = vadd.f32 %v2087_v59, %v3292_v28  ;;  %v2089_v49 = vpop.f32.mrb[15].mxu1 }
0x1d21   :  { %v2542_v62 = vadd.f32 %v2089_v49, %v3296_v29  ;;  %v14_v29 = vstv %s3409_s8 }
0x1d22   :  { %v2209_v55 = vmul.f32 -1.442695, %v2541_v60  ;;  %15 = vst [vmem:[#allocation5] sm:$0x1] %v14_v29 }
0x1d23   :  { %v2210_v4 = vmul.f32 -1.442695, %v2542_v62 }
0x1d24   :  { %2755 = vpow2.f32 %v2209_v55 }
0x1d25   :  { %2757 = vtanh.f32 %v2542_v62 }
0x1d29   :  { %v2212_v36 = vld [vmem:[#allocation5] ss:$0 sm:$0xff] }
0x1d2e   :  { %v2756_v63 = vpop.eup %2755 }
0x1d2f   :  { %v2100_v0 = vadd.f32 1.0, %v2756_v63  ;;  %v2758_v15 = vpop.eup %2757 }
0x1d31   :  { %2759 = vrcp.f32 %v2100_v0 }
0x1d32   :  { %2761 = vpow2.f32 %v2210_v4 }
0x1d3b   :  { %v2760_v1 = vpop.eup %2759 }
0x1d3c   :  { %v2108_v2 = vmul.f32 %v2760_v1, %v2758_v15  ;;  %v2762_v5 = vpop.eup %2761  ;;  %v2107_v56 = vmul.f32 %v2760_v1, %v2011_v50 }
0x1d3d   :  { %v2101_v19 = vadd.f32 1.0, %v2762_v5 }
0x1d3e   :  { %2110 = vrot.lane.b32.xlu0 %v2108_v2, %s2768_s2 }
0x1d3f   :  { %2763 = vrcp.f32 %v2101_v19 }
0x1d49   :  { %v2764_v7 = vpop.eup %2763 }
0x1db0   :  { %v2111_v28 = vpop.permute.xlu0 %2110 }
0x1db1   :  { %v2113_v6 = vadd.f32 %v2111_v28, %v2107_v56 }
0x1db3   :  { %2765 = vtanh.f32 %v2113_v6 }
0x1dbd   :  { %v2766_v8 = vpop.eup %2765 }
0x1dbe   :  { %v2115_v9 = vmul.f32 %v2766_v8, %v2764_v7 }
0x1dc0   :  { %2121 = vrot.lane.b32.xlu1 %v2115_v9, %s2768_s2 }
0x1e32   :  { %v2122_v14 = vpop.permute.xlu1 %2121 }
0x1e33   :  { %v2124_v22 = vsel %vm2118_vm3, %v2122_v14, %v2119_v13 }
0x1e34   :  { %v2132_v16 = vmul.f32 %v2211_v12, %v2124_v22 }
0x1e36   :  { %v2133_v35 = vsel %vm237_vm2, %v2132_v16, 0.0 }
0x1e37   :  { %2134 = vadd.xlane.f32.xlu0 %v2133_v35 }
0x1ec4   :  { %v2135_v17 = vpop.xlane.xlu0 %2134 }
0x1ec5   :  { %v2143_v18 = vadd.f32 %v2212_v36, %v2135_v17 }
0x1ec7   :  { %2145 = vst.msk [vmem:[%s3411_s9] sm:$0xff] %vm2144_vm4, %v2143_v18 }

</bundles_post_ra>
